<compile_context>
chip_gen: v6e
topology: v6e:2x2x1
jax: 0.10.0
libtpu: 0.0.40
codegen_flags: <defaults>
</compile_context>

<pallas_src>
import functools

import jax
import jax.numpy as jnp
from jax.experimental import pallas as pl
from jax.experimental.pallas import tpu as pltpu


def _silu(v):
    return v * jax.nn.sigmoid(v)


def _round_up(a, m):
    return -(-a // m) * m


def _device_defaults():
    """Generation-aware tiling defaults (trace-time Python, static)."""
    kind = ""
    try:
        kind = jax.devices()[0].device_kind.lower()
    except Exception:
        pass
    if "v7" in kind:
        # 64 MiB physical VMEM / 2 TensorCores: smaller tiles, prefer >=2 grid steps.
        return {"target_rows": 1024, "min_tiles": 2, "vmem_limit": 48 << 20}
    if "v5 lite" in kind or "v5e" in kind or "v5lite" in kind:
        # 128 MiB physical but only 16 MiB default scoped VMEM: must raise the limit.
        return {"target_rows": 2048, "min_tiles": 1, "vmem_limit": 64 << 20}
    # v6e and others: 128 MiB physical, 32 MiB default scoped.
    return {"target_rows": 2048, "min_tiles": 1, "vmem_limit": 80 << 20}


def _select_batch_tiling(B, target_rows, min_tiles):
    """Pick (block_b, padded_B) avoiding full-array padding whenever possible.

    Constraints: block_b must be a multiple of 8 (sublane) or equal to the full
    (padded) batch extent; we prefer a divisor of the 8-rounded batch so no
    pad/slice HBM round-trip is needed.
    """
    if B % 8 != 0:
        # A full-extent single block sidesteps the 8-row alignment rule entirely.
        if B <= target_rows and min_tiles <= 1:
            return B, B
        padded = _round_up(B, 8)  # <=7-row tail pad
    else:
        padded = B

    cap = max(8, min(target_rows, padded))
    if min_tiles > 1 and padded >= 8 * min_tiles:
        # Ensure at least `min_tiles` grid steps (e.g. both v7x TensorCores busy).
        cap = min(cap, max(8, ((padded // min_tiles) // 8) * 8))

    # Largest multiple-of-8 divisor of `padded` not exceeding `cap` -> zero extra pad.
    block_b = 8
    d = 8
    while d <= cap:
        if padded % d == 0:
            block_b = d
        d += 8

    # Degenerate divisor for a big batch (e.g. padded = 8 * large_prime): accept a
    # pad to a larger tile rather than hundreds of tiny pipeline steps.
    if block_b * 32 < min(cap, padded):
        block_b = max(8, (cap // 8) * 8)
        padded = _round_up(padded, block_b)
    return block_b, padded


def bottleneck_kernel(
    x_ref, c_ref,
    w_in_x_ref, w_in_c_ref, b_in_ref,      # wedge_in : fused [W1||W2] split along K, fused bias
    w_out_z_ref, w_out_c_ref, b_out_ref,   # wedge_out: fused [W1||W2] split along K, fused bias
    out_ref, z_ref,
):
    out_dim = z_ref.shape[-1]
    in_dim = out_ref.shape[-1]
    mxu_dtype = w_in_x_ref.dtype

    x_f32 = x_ref[...].astype(jnp.float32)       # kept in f32 for the residual
    x_m = x_ref[...].astype(mxu_dtype)           # MXU operand
    c_m = c_ref[...]                              # already in MXU dtype

    # ---- wedge_in: one fused [B, 2*out] matmul, K split across (x, const) ----
    h = (
        jnp.dot(x_m, w_in_x_ref[...], preferred_element_type=jnp.float32)
        + jnp.dot(c_m, w_in_c_ref[...], preferred_element_type=jnp.float32)
        + b_in_ref[...]
    )
    h1 = h[:, :out_dim]
    h2 = h[:, out_dim:]
    z = _silu(h1) * h2                            # f32 element-wise
    z_ref[...] = z.astype(z_ref.dtype)

    # ---- wedge_out: one fused [B, 2*in] matmul, K split across (silu(z), const) ----
    sz = _silu(z).astype(mxu_dtype)
    g = (
        jnp.dot(sz, w_out_z_ref[...], preferred_element_type=jnp.float32)
        + jnp.dot(c_m, w_out_c_ref[...], preferred_element_type=jnp.float32)
        + b_out_ref[...]
    )
    g1 = g[:, :in_dim]
    g2 = g[:, in_dim:]
    z2 = _silu(g1) * g2

    out_ref[...] = (x_f32 + z2).astype(out_ref.dtype)


def prepare_params(params, compute_dtype=jnp.bfloat16):
    """One-time weight preparation, hoisted off the per-call critical path.

    Fuses the two SwiGLU branch weights into one [K, 2*out] RHS, splits along K
    into the (x | const) halves, casts MXU operands to `compute_dtype`, and
    fuses the biases (kept in f32).
    """
    in_dim = params["w1_out"].shape[1]
    out_dim = params["w1_in"].shape[1]

    w_in = jnp.concatenate([params["w1_in"], params["w2_in"]], axis=1).astype(compute_dtype)
    w_out = jnp.concatenate([params["w1_out"], params["w2_out"]], axis=1).astype(compute_dtype)
    return {
        "w_in_x": w_in[:in_dim],            # [in_dim,    2*out_dim]
        "w_in_c": w_in[in_dim:],            # [const_dim, 2*out_dim]
        "b_in": jnp.concatenate([params["b1_in"], params["b2_in"]], axis=1).astype(jnp.float32),
        "w_out_z": w_out[:out_dim],         # [out_dim,   2*in_dim]
        "w_out_c": w_out[out_dim:],         # [const_dim, 2*in_dim]
        "b_out": jnp.concatenate([params["b1_out"], params["b2_out"]], axis=1).astype(jnp.float32),
    }


@functools.partial(jax.jit, static_argnames=("block_b", "out_dtype", "z_dtype"))
def bottleneck_pallas(x, const, prep, *, block_b=None, out_dtype=None, z_dtype=None):
    B, in_dim = x.shape
    _, const_dim = const.shape
    out_dim = prep["w_in_x"].shape[1] // 2
    compute_dtype = prep["w_in_x"].dtype
    out_dtype = x.dtype if out_dtype is None else out_dtype
    z_dtype = x.dtype if z_dtype is None else z_dtype

    cfg = _device_defaults()
    if block_b is None:
        block_b, b_padded = _select_batch_tiling(B, cfg["target_rows"], cfg["min_tiles"])
    else:
        block_b = B if block_b >= B else max(8, (block_b // 8) * 8)
        b_padded = B if block_b == B else _round_up(B, block_b)

    # const is only a matmul operand -> stream it in bf16 (half the DMA bytes).
    const_m = const.astype(compute_dtype)
    x_in = x
    if b_padded != B:
        # Only reached for a <=7-row tail (or the prime-batch fallback).
        pad = b_padded - B
        x_in = jnp.pad(x_in, ((0, pad), (0, 0)))
        const_m = jnp.pad(const_m, ((0, pad), (0, 0)))

    grid = (b_padded // block_b,)

    def row_map(i):
        return (i, 0)

    def fixed_map(i):
        return (0, 0)

    in_specs = [
        pl.BlockSpec((block_b, in_dim), row_map),                 # x (f32)
        pl.BlockSpec((block_b, const_dim), row_map),              # const (bf16)
        pl.BlockSpec((in_dim, 2 * out_dim), fixed_map),           # w_in_x
        pl.BlockSpec((const_dim, 2 * out_dim), fixed_map),        # w_in_c
        pl.BlockSpec((1, 2 * out_dim), fixed_map),                # b_in (fused, f32)
        pl.BlockSpec((out_dim, 2 * in_dim), fixed_map),           # w_out_z
        pl.BlockSpec((const_dim, 2 * in_dim), fixed_map),         # w_out_c
        pl.BlockSpec((1, 2 * in_dim), fixed_map),                 # b_out (fused, f32)
    ]
    out_specs = [
        pl.BlockSpec((block_b, in_dim), row_map),                 # out_
        pl.BlockSpec((block_b, out_dim), row_map),                # z
    ]
    out_shape = (
        jax.ShapeDtypeStruct((b_padded, in_dim), out_dtype),
        jax.ShapeDtypeStruct((b_padded, out_dim), z_dtype),
    )

    out_, z = pl.pallas_call(
        bottleneck_kernel,
        grid_spec=pltpu.PrefetchScalarGridSpec(
            num_scalar_prefetch=0,
            grid=grid,
            in_specs=in_specs,
            out_specs=out_specs,
        ),
        out_shape=out_shape,
        compiler_params=pltpu.CompilerParams(
            dimension_semantics=("parallel",),
            vmem_limit_bytes=cfg["vmem_limit"],
        ),
    )(x_in, const_m, prep["w_in_x"], prep["w_in_c"], prep["b_in"],
      prep["w_out_z"], prep["w_out_c"], prep["b_out"])

    if b_padded != B:
        out_ = out_[:B]
        z = z[:B]
    return out_, z


def bottleneck_reference(x, const, params, compute_dtype=jnp.bfloat16):
    """Pure-JAX reference mirroring the PyTorch forward at the kernel's precision
    (bf16 MXU operands, f32 accumulation / element-wise / residual)."""
    w1i = params["w1_in"].astype(compute_dtype)
    w2i = params["w2_in"].astype(compute_dtype)
    w1o = params["w1_out"].astype(compute_dtype)
    w2o = params["w2_out"].astype(compute_dtype)

    xc = jnp.concatenate([x.astype(compute_dtype), const.astype(compute_dtype)], axis=-1)
    h1 = jnp.dot(xc, w1i, preferred_element_type=jnp.float32) + params["b1_in"]
    h2 = jnp.dot(xc, w2i, preferred_element_type=jnp.float32) + params["b2_in"]
    z = _silu(h1) * h2

    zc = jnp.concatenate([_silu(z).astype(compute_dtype), const.astype(compute_dtype)], axis=-1)
    g1 = jnp.dot(zc, w1o, preferred_element_type=jnp.float32) + params["b1_out"]
    g2 = jnp.dot(zc, w2o, preferred_element_type=jnp.float32) + params["b2_out"]
    z2 = _silu(g1) * g2

    return x + z2, z


def init_params(key, in_dim, out_dim, const_dim, dtype=jnp.float32):
    """Deterministic synthetic init (Linear weights stored as [in, out])."""
    ks = jax.random.split(key, 8)
    d_in1 = in_dim + const_dim      # wedge_in  input dim
    d_in2 = out_dim + const_dim     # wedge_out input dim
    s1 = 1.0 / jnp.sqrt(d_in1)
    s2 = 1.0 / jnp.sqrt(d_in2)
    return {
        "w1_in": (jax.random.normal(ks[0], (d_in1, out_dim)) * s1).astype(dtype),
        "w2_in": (jax.random.normal(ks[1], (d_in1, out_dim)) * s1).astype(dtype),
        "b1_in": (jax.random.normal(ks[2], (1, out_dim)) * 0.01).astype(dtype),
        "b2_in": (jax.random.normal(ks[3], (1, out_dim)) * 0.01).astype(dtype),
        "w1_out": (jax.random.normal(ks[4], (d_in2, in_dim)) * s2).astype(dtype),
        "w2_out": (jax.random.normal(ks[5], (d_in2, in_dim)) * s2).astype(dtype),
        "b1_out": (jax.random.normal(ks[6], (1, in_dim)) * 0.01).astype(dtype),
        "b2_out": (jax.random.normal(ks[7], (1, in_dim)) * 0.01).astype(dtype),
    }


if __name__ == "__main__":
    # Small shapes; feature dims match the module defaults (256).
    B, IN_DIM, OUT_DIM, CONST_DIM = 8, 256, 256, 256

    key = jax.random.PRNGKey(0)
    kx, kc, kp = jax.random.split(key, 3)
    x = jax.random.normal(kx, (B, IN_DIM), dtype=jnp.float32)
    const = jax.random.normal(kc, (B, CONST_DIM), dtype=jnp.float32)
    params = init_params(kp, IN_DIM, OUT_DIM, CONST_DIM)

    # One-time weight prep (off the per-call critical path), then the kernel.
    prep = prepare_params(params)
    jax.block_until_ready(prep)

    out_, z = bottleneck_pallas(x, const, prep)
    jax.block_until_ready((out_, z))

    ref_out, ref_z = bottleneck_reference(x, const, params)
    assert out_.shape == (B, IN_DIM) and z.shape == (B, OUT_DIM)
    assert jnp.allclose(out_, ref_out, atol=1e-3, rtol=1e-3)
    assert jnp.allclose(z, ref_z, atol=1e-3, rtol=1e-3)

    print("KERNEL_OK")
</pallas_src>

<mosaic_0001>
module attributes {stable_mosaic.version = 11 : i64} {
  func.func @bottleneck_kernel(%arg0: i32, %arg1: memref<8x256xf32, #tpu.memory_space<vmem>>, %arg2: memref<8x256xbf16, #tpu.memory_space<vmem>>, %arg3: memref<256x512xbf16, #tpu.memory_space<vmem>>, %arg4: memref<256x512xbf16, #tpu.memory_space<vmem>>, %arg5: memref<1x512xf32, #tpu.memory_space<vmem>>, %arg6: memref<256x512xbf16, #tpu.memory_space<vmem>>, %arg7: memref<256x512xbf16, #tpu.memory_space<vmem>>, %arg8: memref<1x512xf32, #tpu.memory_space<vmem>>, %arg9: memref<8x256xf32, #tpu.memory_space<vmem>>, %arg10: memref<8x256xf32, #tpu.memory_space<vmem>>) attributes {dimension_semantics = [#tpu.dimension_semantics<parallel>], iteration_bounds = array<i64: 1>, scalar_prefetch = 0 : i64, scratch_operands = 0 : i64, tpu.core_type = #tpu.core_type<tc>, window_params = [{transform_indices = @transform_0, window_bounds = array<i64: 8, 256>}, {transform_indices = @transform_1, window_bounds = array<i64: 8, 256>}, {pipeline_mode = #tpu.pipeline_mode<synchronous>, transform_indices = @transform_2, window_bounds = array<i64: 256, 512>}, {pipeline_mode = #tpu.pipeline_mode<synchronous>, transform_indices = @transform_3, window_bounds = array<i64: 256, 512>}, {pipeline_mode = #tpu.pipeline_mode<synchronous>, transform_indices = @transform_4, window_bounds = array<i64: 1, 512>}, {pipeline_mode = #tpu.pipeline_mode<synchronous>, transform_indices = @transform_5, window_bounds = array<i64: 256, 512>}, {pipeline_mode = #tpu.pipeline_mode<synchronous>, transform_indices = @transform_6, window_bounds = array<i64: 256, 512>}, {pipeline_mode = #tpu.pipeline_mode<synchronous>, transform_indices = @transform_7, window_bounds = array<i64: 1, 512>}, {transform_indices = @transform_8, window_bounds = array<i64: 8, 256>}, {transform_indices = @transform_9, window_bounds = array<i64: 8, 256>}]} {
    %c0 = arith.constant 0 : index
    %c0_0 = arith.constant 0 : index
    %0 = vector.load %arg1[%c0, %c0_0] : memref<8x256xf32, #tpu.memory_space<vmem>>, vector<8x256xf32>
    %c0_1 = arith.constant 0 : index
    %c0_2 = arith.constant 0 : index
    %1 = vector.load %arg1[%c0_1, %c0_2] : memref<8x256xf32, #tpu.memory_space<vmem>>, vector<8x256xf32>
    %2 = arith.truncf %1 : vector<8x256xf32> to vector<8x256xbf16>
    %c0_3 = arith.constant 0 : index
    %c0_4 = arith.constant 0 : index
    %3 = vector.load %arg2[%c0_3, %c0_4] : memref<8x256xbf16, #tpu.memory_space<vmem>>, vector<8x256xbf16>
    %c0_5 = arith.constant 0 : index
    %c0_6 = arith.constant 0 : index
    %4 = vector.load %arg3[%c0_5, %c0_6] : memref<256x512xbf16, #tpu.memory_space<vmem>>, vector<256x512xbf16>
    %cst = arith.constant dense<0.000000e+00> : vector<8x512xf32>
    %5 = tpu.matmul %2, %4, %cst {dimension_numbers = #tpu.dot_dimension_numbers<[1], [0], [0], [1], [0, 0, 1, 1], [], []>} : vector<8x256xbf16>, vector<256x512xbf16>, vector<8x512xf32> -> vector<8x512xf32>
    %c0_7 = arith.constant 0 : index
    %c0_8 = arith.constant 0 : index
    %6 = vector.load %arg4[%c0_7, %c0_8] : memref<256x512xbf16, #tpu.memory_space<vmem>>, vector<256x512xbf16>
    %cst_9 = arith.constant dense<0.000000e+00> : vector<8x512xf32>
    %7 = tpu.matmul %3, %6, %cst_9 {dimension_numbers = #tpu.dot_dimension_numbers<[1], [0], [0], [1], [0, 0, 1, 1], [], []>} : vector<8x256xbf16>, vector<256x512xbf16>, vector<8x512xf32> -> vector<8x512xf32>
    %8 = arith.addf %5, %7 : vector<8x512xf32>
    %c0_10 = arith.constant 0 : index
    %c0_11 = arith.constant 0 : index
    %9 = vector.load %arg5[%c0_10, %c0_11] : memref<1x512xf32, #tpu.memory_space<vmem>>, vector<1x512xf32>
    %10 = vector.broadcast %9 : vector<1x512xf32> to vector<8x512xf32>
    %11 = arith.addf %8, %10 : vector<8x512xf32>
    %12 = vector.extract_strided_slice %11 {offsets = [0, 0], sizes = [8, 256], strides = [1, 1]} : vector<8x512xf32> to vector<8x256xf32>
    %13 = vector.extract_strided_slice %11 {offsets = [0, 256], sizes = [8, 256], strides = [1, 1]} : vector<8x512xf32> to vector<8x256xf32>
    %14 = arith.negf %12 : vector<8x256xf32>
    %15 = math.exp %14 : vector<8x256xf32>
    %cst_12 = arith.constant 1.000000e+00 : f32
    %16 = vector.broadcast %cst_12 : f32 to vector<8x256xf32>
    %17 = arith.addf %16, %15 : vector<8x256xf32>
    %18 = arith.divf %16, %17 : vector<8x256xf32>
    %19 = arith.mulf %12, %18 : vector<8x256xf32>
    %20 = arith.mulf %19, %13 : vector<8x256xf32>
    %c0_13 = arith.constant 0 : index
    %c0_14 = arith.constant 0 : index
    %21 = vector.load %arg10[%c0_13, %c0_14] : memref<8x256xf32, #tpu.memory_space<vmem>>, vector<8x256xf32>
    tpu.vector_store %arg10[%c0_13, %c0_14], %20 {strides = array<i32>} : memref<8x256xf32, #tpu.memory_space<vmem>>, vector<8x256xf32>,
    %22 = arith.negf %20 : vector<8x256xf32>
    %23 = math.exp %22 : vector<8x256xf32>
    %cst_15 = arith.constant 1.000000e+00 : f32
    %24 = vector.broadcast %cst_15 : f32 to vector<8x256xf32>
    %25 = arith.addf %24, %23 : vector<8x256xf32>
    %26 = arith.divf %24, %25 : vector<8x256xf32>
    %27 = arith.mulf %20, %26 : vector<8x256xf32>
    %28 = arith.truncf %27 : vector<8x256xf32> to vector<8x256xbf16>
    %c0_16 = arith.constant 0 : index
    %c0_17 = arith.constant 0 : index
    %29 = vector.load %arg6[%c0_16, %c0_17] : memref<256x512xbf16, #tpu.memory_space<vmem>>, vector<256x512xbf16>
    %cst_18 = arith.constant dense<0.000000e+00> : vector<8x512xf32>
    %30 = tpu.matmul %28, %29, %cst_18 {dimension_numbers = #tpu.dot_dimension_numbers<[1], [0], [0], [1], [0, 0, 1, 1], [], []>} : vector<8x256xbf16>, vector<256x512xbf16>, vector<8x512xf32> -> vector<8x512xf32>
    %c0_19 = arith.constant 0 : index
    %c0_20 = arith.constant 0 : index
    %31 = vector.load %arg7[%c0_19, %c0_20] : memref<256x512xbf16, #tpu.memory_space<vmem>>, vector<256x512xbf16>
    %cst_21 = arith.constant dense<0.000000e+00> : vector<8x512xf32>
    %32 = tpu.matmul %3, %31, %cst_21 {dimension_numbers = #tpu.dot_dimension_numbers<[1], [0], [0], [1], [0, 0, 1, 1], [], []>} : vector<8x256xbf16>, vector<256x512xbf16>, vector<8x512xf32> -> vector<8x512xf32>
    %33 = arith.addf %30, %32 : vector<8x512xf32>
    %c0_22 = arith.constant 0 : index
    %c0_23 = arith.constant 0 : index
    %34 = vector.load %arg8[%c0_22, %c0_23] : memref<1x512xf32, #tpu.memory_space<vmem>>, vector<1x512xf32>
    %35 = vector.broadcast %34 : vector<1x512xf32> to vector<8x512xf32>
    %36 = arith.addf %33, %35 : vector<8x512xf32>
    %37 = vector.extract_strided_slice %36 {offsets = [0, 0], sizes = [8, 256], strides = [1, 1]} : vector<8x512xf32> to vector<8x256xf32>
    %38 = vector.extract_strided_slice %36 {offsets = [0, 256], sizes = [8, 256], strides = [1, 1]} : vector<8x512xf32> to vector<8x256xf32>
    %39 = arith.negf %37 : vector<8x256xf32>
    %40 = math.exp %39 : vector<8x256xf32>
    %cst_24 = arith.constant 1.000000e+00 : f32
    %41 = vector.broadcast %cst_24 : f32 to vector<8x256xf32>
    %42 = arith.addf %41, %40 : vector<8x256xf32>
    %43 = arith.divf %41, %42 : vector<8x256xf32>
    %44 = arith.mulf %37, %43 : vector<8x256xf32>
    %45 = arith.mulf %44, %38 : vector<8x256xf32>
    %46 = arith.addf %0, %45 : vector<8x256xf32>
    %c0_25 = arith.constant 0 : index
    %c0_26 = arith.constant 0 : index
    %47 = vector.load %arg9[%c0_25, %c0_26] : memref<8x256xf32, #tpu.memory_space<vmem>>, vector<8x256xf32>
    tpu.vector_store %arg9[%c0_25, %c0_26], %46 {strides = array<i32>} : memref<8x256xf32, #tpu.memory_space<vmem>>, vector<8x256xf32>,
    return
  }
  func.func @transform_0(%arg0: i32) -> (i32, i32) {
    %c0_i32 = arith.constant 0 : i32
    %c0_i32_0 = arith.constant 0 : i32
    return %arg0, %c0_i32 : i32, i32
  }
  func.func @transform_1(%arg0: i32) -> (i32, i32) {
    %c0_i32 = arith.constant 0 : i32
    %c0_i32_0 = arith.constant 0 : i32
    return %arg0, %c0_i32 : i32, i32
  }
  func.func @transform_2(%arg0: i32) -> (i32, i32) {
    %c0_i32 = arith.constant 0 : i32
    %c0_i32_0 = arith.constant 0 : i32
    %c0_i32_1 = arith.constant 0 : i32
    return %c0_i32, %c0_i32_0 : i32, i32
  }
  func.func @transform_3(%arg0: i32) -> (i32, i32) {
    %c0_i32 = arith.constant 0 : i32
    %c0_i32_0 = arith.constant 0 : i32
    %c0_i32_1 = arith.constant 0 : i32
    return %c0_i32, %c0_i32_0 : i32, i32
  }
  func.func @transform_4(%arg0: i32) -> (i32, i32) {
    %c0_i32 = arith.constant 0 : i32
    %c0_i32_0 = arith.constant 0 : i32
    %c0_i32_1 = arith.constant 0 : i32
    return %c0_i32, %c0_i32_0 : i32, i32
  }
  func.func @transform_5(%arg0: i32) -> (i32, i32) {
    %c0_i32 = arith.constant 0 : i32
    %c0_i32_0 = arith.constant 0 : i32
    %c0_i32_1 = arith.constant 0 : i32
    return %c0_i32, %c0_i32_0 : i32, i32
  }
  func.func @transform_6(%arg0: i32) -> (i32, i32) {
    %c0_i32 = arith.constant 0 : i32
    %c0_i32_0 = arith.constant 0 : i32
    %c0_i32_1 = arith.constant 0 : i32
    return %c0_i32, %c0_i32_0 : i32, i32
  }
  func.func @transform_7(%arg0: i32) -> (i32, i32) {
    %c0_i32 = arith.constant 0 : i32
    %c0_i32_0 = arith.constant 0 : i32
    %c0_i32_1 = arith.constant 0 : i32
    return %c0_i32, %c0_i32_0 : i32, i32
  }
  func.func @transform_8(%arg0: i32) -> (i32, i32) {
    %c0_i32 = arith.constant 0 : i32
    %c0_i32_0 = arith.constant 0 : i32
    return %arg0, %c0_i32 : i32, i32
  }
  func.func @transform_9(%arg0: i32) -> (i32, i32) {
    %c0_i32 = arith.constant 0 : i32
    %c0_i32_0 = arith.constant 0 : i32
    return %arg0, %c0_i32 : i32, i32
  }
}

</mosaic_0001>

<bundles_post_ra>
// kernel: bottleneck_pallas.1
= control target key start
LH: loop header
LB: loop body
LE: loop exit
PB: predicated region body
PF: predicated region fallthrough
CT: control target
= control target key end

     0   :  { %15 = vsyncpa [#allocation3], 0  ;;  %s3062_s0 = inlined_call_operand.vmem [shape: f32[8,256], index: 0, kind: input, shape index: {}]   ;;  %s3063_s1 = inlined_call_operand.vmem [shape: bf16[8,256], index: 1, kind: input, shape index: {}]   ;;  %s3064_s2 = inlined_call_operand.hbm [shape: bf16[256,512], index: 2, kind: input, shape index: {}]   ;;  %s3065_s3 = inlined_call_operand.hbm [shape: bf16[256,512], index: 3, kind: input, shape index: {}]   ;;  %s3066_s4 = inlined_call_operand.vmem [shape: f32[1,512], index: 4, kind: input, shape index: {}]   ;;  %s3067_s5 = inlined_call_operand.hbm [shape: bf16[256,512], index: 5, kind: input, shape index: {}]   ;;  %s3068_s6 = inlined_call_operand.hbm [shape: bf16[256,512], index: 6, kind: input, shape index: {}]   ;;  %s3069_s7 = inlined_call_operand.vmem [shape: f32[1,512], index: 7, kind: input, shape index: {}]   ;;  %s3070_s8 = inlined_call_operand.hbm [shape: f32[8,256], index: 8, kind: output, shape index: {0}]   ;;  %s3071_s9 = inlined_call_operand.hbm [shape: f32[8,256], index: 9, kind: output, shape index: {1}]  }
   0x1   :  { %16 = vsyncpa [#allocation6], 0 }
   0x2   :  { %17 = vsyncpa [#allocation9], 0 }
   0x3   :  { %18 = vsyncpa [#allocation4], 0 }
   0x4   :  { %19 = vsyncpa [#allocation12], 0  ;;  %s2914_s30 = smov [#allocation5]   ;;  %s2915_s11 = smov [#allocation2]  }
   0x5   :  { %s41_s10 = sshll.u32 %s2914_s30, 4  ;;  %s29_s12 = sshll.u32 %s2915_s11, 4  ;;  %s42_s10 = int_to_ptr.vmem [resolvable:$true] %s41_s10  ;;  %s30_s12 = int_to_ptr.vmem [resolvable:$true] %s29_s12 }
   0x6   :  { %s2792_s13 = scalar_lea.vmem %s42_s10, 8192  ;;  %p2797_p1 = scmp.lt.s32.totalorder %s42_s10, %s42_s10 }
   0x7   :  { %p2793_p0 = scmp.ne.s32.totalorder %s42_s10, %s2792_s13  ;;  %p2798_p2 = scmp.lt.s32.totalorder %s2792_s13, %s2792_s13 }
   0x9   :  { %p2799_p3 = por %p2798_p2, %p2797_p1 }
   0xb   :  { %p2800_p4 = pnand %p2799_p3, %p2793_p0 }
   0xd   :  { %2803 = shalt.err (!%p2800_p4)
}
   0xe   :  { %s2916_s14 = smov 256   ;;  %s2917_s15 = smov 16  }
   0xf   :  { %47 = dma.hbm_to_vmem [thread:$0]  %s3065_s3, 8192, %s42_s10, [#allocation6], %s2916_s14, %s2916_s14, %s2917_s15  }
  0x10   :  { %s2812_s18 = scalar_lea.vmem %s30_s12, 8192  ;;  %p2817_p6 = scmp.lt.s32.totalorder %s30_s12, %s30_s12 }
  0x11   :  { %p2813_p5 = scmp.ne.s32.totalorder %s30_s12, %s2812_s18  ;;  %p2818_p7 = scmp.lt.s32.totalorder %s2812_s18, %s2812_s18 }
  0x13   :  { %p2819_p8 = por %p2818_p7, %p2817_p6 }
  0x15   :  { %p2820_p9 = pnand %p2819_p8, %p2813_p5 }
  0x17   :  { %2823 = shalt.err (!%p2820_p9)
}
  0x18   :  { %35 = dma.hbm_to_vmem [thread:$0]  %s3064_s2, 8192, %s30_s12, [#allocation3], %s2916_s14, %s2916_s14, %s2917_s15  }
  0x19   :  { %s2918_s21 = smov [#allocation7]   ;;  %s2919_s23 = smov [#allocation8]  }
  0x1a   :  { %s55_s22 = sshll.u32 %s2918_s21, 4  ;;  %s67_s24 = sshll.u32 %s2919_s23, 4  ;;  %s56_s22 = int_to_ptr.vmem [resolvable:$true] %s55_s22  ;;  %s68_s24 = int_to_ptr.vmem [resolvable:$true] %s67_s24 }
  0x1b   :  { %s2832_s3 = scalar_lea.vmem %s56_s22, 8192  ;;  %p2837_p11 = scmp.lt.s32.totalorder %s56_s22, %s56_s22 }
  0x1c   :  { %p2833_p10 = scmp.ne.s32.totalorder %s56_s22, %s2832_s3  ;;  %p2838_p12 = scmp.lt.s32.totalorder %s2832_s3, %s2832_s3 }
  0x1e   :  { %p2839_p13 = por %p2838_p12, %p2837_p11 }
  0x20   :  { %p2840_p0 = pnand %p2839_p13, %p2833_p10 }
  0x22   :  { %2843 = shalt.err (!%p2840_p0)
}
  0x23   :  { %61 = dma.hbm_to_vmem [thread:$0]  %s3067_s5, 8192, %s56_s22, [#allocation6], %s2916_s14, %s2916_s14, %s2917_s15  }
  0x24   :  { %s2852_s2 = scalar_lea.vmem %s68_s24, 8192  ;;  %p2857_p2 = scmp.lt.s32.totalorder %s68_s24, %s68_s24 }
  0x25   :  { %p2853_p1 = scmp.ne.s32.totalorder %s68_s24, %s2852_s2  ;;  %p2858_p3 = scmp.lt.s32.totalorder %s2852_s2, %s2852_s2 }
  0x27   :  { %p2859_p4 = por %p2858_p3, %p2857_p2 }
  0x29   :  { %p2860_p5 = pnand %p2859_p4, %p2853_p1 }
  0x2b   :  { %2863 = shalt.err (!%p2860_p5)
}
  0x2c   :  { %73 = dma.hbm_to_vmem [thread:$0]  %s3068_s6, 8192, %s68_s24, [#allocation9], %s2916_s14, %s2916_s14, %s2917_s15  }
  0x2d   :  { %2904 = dma.done.wait [#allocation3], 8192  }
  0x2e   :  { %2905 = vsyncadd [#allocation3], 4294959104 }
  0x2f   :  { %2906 = dma.done.wait [#allocation6], 16384  }
  0x30   :  { %2907 = vsyncadd [#allocation6], 4294950912 }
  0x31   :  { %2908 = dma.done.wait [#allocation9], 8192  }
  0x32   :  { %2909 = vsyncadd [#allocation9], 4294959104  ;;  %v2373_v0 = vld [vmem:[#allocation5 + $0xe4] ss:$16 sps:$4 sm:$0xff]   ;;  %v2375_v1 = vld [vmem:[#allocation5 + $0xec] ss:$16 sps:$4 sm:$0xff]  }
  0x33   :  { %548 = vmatprep.subr.bf16.mxu0 %v2373_v0  ;;  %v2377_v2 = vld [vmem:[#allocation5 + $0xe0] ss:$16 sps:$4 sm:$0xff]   ;;  %v2378_v3 = vld [vmem:[#allocation5 + $0xe8] ss:$16 sps:$4 sm:$0xff]   ;;  %589 = vmatprep.subr.bf16.mxu1 %v2375_v1  ;;  %v2379_v4 = vld [vmem:[#allocation5 + $0xc4] ss:$16 sps:$4 sm:$0xff]  }
  0x34   :  { %549 = vmatpush1.bf16.msra.mxu0 %v2377_v2  ;;  %590 = vmatpush1.bf16.msra.mxu1 %v2378_v3  ;;  %v2381_v5 = vld [vmem:[#allocation5 + $0xcc] ss:$16 sps:$4 sm:$0xff]   ;;  %v2383_v6 = vld [vmem:[#allocation5 + $0xc0] ss:$16 sps:$4 sm:$0xff]   ;;  %v2384_v7 = vld [vmem:[#allocation5 + $0xc8] ss:$16 sps:$4 sm:$0xff]  }
  0x35   :  { %550 = vmatprep.subr.bf16.mxu0 %v2379_v4  ;;  %591 = vmatprep.subr.bf16.mxu1 %v2381_v5  ;;  %v2385_v8 = vld [vmem:[#allocation5 + $0xa4] ss:$16 sps:$4 sm:$0xff]   ;;  %v2387_v9 = vld [vmem:[#allocation5 + $0xac] ss:$16 sps:$4 sm:$0xff]   ;;  %v2389_v10 = vld [vmem:[#allocation5 + $0xa0] ss:$16 sps:$4 sm:$0xff]  }
  0x36   :  { %v2390_v11 = vld [vmem:[#allocation5 + $0xa8] ss:$16 sps:$4 sm:$0xff]   ;;  %v2391_v12 = vld [vmem:[#allocation5 + $0x84] ss:$16 sps:$4 sm:$0xff]   ;;  %v2393_v13 = vld [vmem:[#allocation5 + $0x8c] ss:$16 sps:$4 sm:$0xff]  }
  0x37   :  { %v2395_v14 = vld [vmem:[#allocation5 + $0x80] ss:$16 sps:$4 sm:$0xff]   ;;  %v2396_v15 = vld [vmem:[#allocation5 + $0x88] ss:$16 sps:$4 sm:$0xff]   ;;  %v2397_v16 = vld [vmem:[#allocation5 + $0x64] ss:$16 sps:$4 sm:$0xff]  }
  0x38   :  { %551 = vmatpush1.bf16.msra.mxu0 %v2383_v6  ;;  %592 = vmatpush1.bf16.msra.mxu1 %v2384_v7  ;;  %v2399_v17 = vld [vmem:[#allocation5 + $0x6c] ss:$16 sps:$4 sm:$0xff]   ;;  %v2401_v18 = vld [vmem:[#allocation5 + $0x60] ss:$16 sps:$4 sm:$0xff]   ;;  %v2402_v19 = vld [vmem:[#allocation5 + $0x68] ss:$16 sps:$4 sm:$0xff]  }
  0x39   :  { %552 = vmatprep.subr.bf16.mxu0 %v2385_v8  ;;  %593 = vmatprep.subr.bf16.mxu1 %v2387_v9  ;;  %v2403_v20 = vld [vmem:[#allocation5 + $0x44] ss:$16 sps:$4 sm:$0xff]   ;;  %v2405_v21 = vld [vmem:[#allocation5 + $0x4c] ss:$16 sps:$4 sm:$0xff]   ;;  %v2407_v22 = vld [vmem:[#allocation5 + $0x40] ss:$16 sps:$4 sm:$0xff]  }
  0x3a   :  { %v2408_v23 = vld [vmem:[#allocation5 + $0x48] ss:$16 sps:$4 sm:$0xff]   ;;  %v2409_v24 = vld [vmem:[#allocation5 + $0x24] ss:$16 sps:$4 sm:$0xff]   ;;  %v2411_v25 = vld [vmem:[#allocation5 + $0x2c] ss:$16 sps:$4 sm:$0xff]  }
  0x3b   :  { %v2413_v26 = vld [vmem:[#allocation5 + $0x20] ss:$16 sps:$4 sm:$0xff]   ;;  %v2414_v27 = vld [vmem:[#allocation5 + $0x28] ss:$16 sps:$4 sm:$0xff]   ;;  %v2415_v28 = vld [vmem:[#allocation5 + $0x4] ss:$16 sps:$4 sm:$0xff]  }
  0x3c   :  { %553 = vmatpush1.bf16.msra.mxu0 %v2389_v10  ;;  %594 = vmatpush1.bf16.msra.mxu1 %v2390_v11  ;;  %v2417_v29 = vld [vmem:[#allocation5 + $0xc] ss:$16 sps:$4 sm:$0xff]   ;;  %v2419_v30 = vld [vmem:[#allocation5] ss:$16 sps:$4 sm:$0xff]   ;;  %v2420_v31 = vld [vmem:[#allocation5 + $0x8] ss:$16 sps:$4 sm:$0xff]  }
  0x3d   :  { %554 = vmatprep.subr.bf16.mxu0 %v2391_v12  ;;  %595 = vmatprep.subr.bf16.mxu1 %v2393_v13  ;;  %v2421_v32 = vld [vmem:[#allocation5 + $0x1e4] ss:$16 sps:$4 sm:$0xff]   ;;  %v2423_v33 = vld [vmem:[#allocation5 + $0x1ec] ss:$16 sps:$4 sm:$0xff]   ;;  %v2425_v34 = vld [vmem:[#allocation5 + $0x1e0] ss:$16 sps:$4 sm:$0xff]  }
  0x3e   :  { %v2426_v35 = vld [vmem:[#allocation5 + $0x1e8] ss:$16 sps:$4 sm:$0xff]   ;;  %v2427_v36 = vld [vmem:[#allocation5 + $0x1c4] ss:$16 sps:$4 sm:$0xff]   ;;  %v2429_v37 = vld [vmem:[#allocation5 + $0x1cc] ss:$16 sps:$4 sm:$0xff]  }
  0x3f   :  { %v2431_v38 = vld [vmem:[#allocation5 + $0x1c0] ss:$16 sps:$4 sm:$0xff]   ;;  %v2432_v39 = vld [vmem:[#allocation5 + $0x1c8] ss:$16 sps:$4 sm:$0xff]   ;;  %v2433_v40 = vld [vmem:[#allocation5 + $0x1a4] ss:$16 sps:$4 sm:$0xff]  }
  0x40   :  { %555 = vmatpush1.bf16.msra.mxu0 %v2395_v14  ;;  %596 = vmatpush1.bf16.msra.mxu1 %v2396_v15  ;;  %v2435_v41 = vld [vmem:[#allocation5 + $0x1ac] ss:$16 sps:$4 sm:$0xff]   ;;  %v2437_v42 = vld [vmem:[#allocation5 + $0x1a0] ss:$16 sps:$4 sm:$0xff]   ;;  %v2438_v43 = vld [vmem:[#allocation5 + $0x1a8] ss:$16 sps:$4 sm:$0xff]  }
  0x41   :  { %556 = vmatprep.subr.bf16.mxu0 %v2397_v16  ;;  %597 = vmatprep.subr.bf16.mxu1 %v2399_v17  ;;  %v2439_v44 = vld [vmem:[#allocation5 + $0x184] ss:$16 sps:$4 sm:$0xff]   ;;  %v2441_v45 = vld [vmem:[#allocation5 + $0x18c] ss:$16 sps:$4 sm:$0xff]   ;;  %v2443_v47 = vld [vmem:[#allocation5 + $0x180] ss:$16 sps:$4 sm:$0xff]  }
  0x42   :  { %v92_v46 = vld [vmem:[%s3063_s1] sm:$0xff]  ;;  %v2444_v49 = vld [vmem:[#allocation5 + $0x188] ss:$16 sps:$4 sm:$0xff]   ;;  %v2447_v51 = vld [vmem:[#allocation5 + $0x16c] ss:$16 sps:$4 sm:$0xff]  }
  0x43   :  { %v2999_v48 = vcombine.high %v92_v46, %v92_v46  ;;  %v2445_v50 = vld [vmem:[#allocation5 + $0x164] ss:$16 sps:$4 sm:$0xff]   ;;  %v2449_v52 = vld [vmem:[#allocation5 + $0x160] ss:$16 sps:$4 sm:$0xff]   ;;  %v2450_v53 = vld [vmem:[#allocation5 + $0x168] ss:$16 sps:$4 sm:$0xff]   ;;  %v3003_v4 = vcombine.low %v92_v46, %v92_v46 }
  0x44   :  { %557 = vmatpush1.bf16.msra.mxu0 %v2401_v18  ;;  %598 = vmatpush1.bf16.msra.mxu1 %v2402_v19  ;;  %v2451_v54 = vld [vmem:[#allocation5 + $0x144] ss:$16 sps:$4 sm:$0xff]   ;;  %v2453_v55 = vld [vmem:[#allocation5 + $0x14c] ss:$16 sps:$4 sm:$0xff]   ;;  %v2455_v56 = vld [vmem:[#allocation5 + $0x140] ss:$16 sps:$4 sm:$0xff]  }
  0x45   :  { %558 = vmatprep.subr.bf16.mxu0 %v2403_v20  ;;  %599 = vmatprep.subr.bf16.mxu1 %v2405_v21  ;;  %v2456_v57 = vld [vmem:[#allocation5 + $0x148] ss:$16 sps:$4 sm:$0xff]   ;;  %v2457_v58 = vld [vmem:[#allocation5 + $0x124] ss:$16 sps:$4 sm:$0xff]   ;;  %v2459_v59 = vld [vmem:[#allocation5 + $0x12c] ss:$16 sps:$4 sm:$0xff]  }
  0x46   :  { %580 = vmatprep.mubr.bf16.mxu0 %v2999_v48  ;;  %621 = vmatprep.mubr.bf16.mxu1 %v2999_v48  ;;  %v2461_v60 = vld [vmem:[#allocation5 + $0x120] ss:$16 sps:$4 sm:$0xff]   ;;  %v2462_v61 = vld [vmem:[#allocation5 + $0x128] ss:$16 sps:$4 sm:$0xff]   ;;  %v2463_v62 = vld [vmem:[#allocation5 + $0x104] ss:$16 sps:$4 sm:$0xff]  }
  0x47   :  { %v2465_v63 = vld [vmem:[#allocation5 + $0x10c] ss:$16 sps:$4 sm:$0xff]   ;;  %v2467_v0 = vld [vmem:[#allocation5 + $0x100] ss:$16 sps:$4 sm:$0xff]   ;;  %v2468_v1 = vld [vmem:[#allocation5 + $0x108] ss:$16 sps:$4 sm:$0xff]  }
  0x48   :  { %559 = vmatpush1.bf16.msra.mxu0 %v2407_v22  ;;  %600 = vmatpush1.bf16.msra.mxu1 %v2408_v23  ;;  %v2473_v2 = vld [vmem:[#allocation2 + $0xe4] ss:$16 sps:$4 sm:$0xff]   ;;  %v2476_v3 = vld [vmem:[#allocation2 + $0xec] ss:$16 sps:$4 sm:$0xff]   ;;  %v2471_v5 = vld [vmem:[#allocation2 + $0xe0] ss:$16 sps:$4 sm:$0xff]  }
  0x49   :  { %560 = vmatprep.subr.bf16.mxu0 %v2409_v24  ;;  %601 = vmatprep.subr.bf16.mxu1 %v2411_v25  ;;  %v2474_v6 = vld [vmem:[#allocation2 + $0xe8] ss:$16 sps:$4 sm:$0xff]   ;;  %v2479_v7 = vld [vmem:[#allocation2 + $0xc4] ss:$16 sps:$4 sm:$0xff]   ;;  %v2482_v8 = vld [vmem:[#allocation2 + $0xcc] ss:$16 sps:$4 sm:$0xff]  }
  0x4a   :  { %v2477_v9 = vld [vmem:[#allocation2 + $0xc0] ss:$16 sps:$4 sm:$0xff]   ;;  %v2480_v10 = vld [vmem:[#allocation2 + $0xc8] ss:$16 sps:$4 sm:$0xff]   ;;  %v2485_v11 = vld [vmem:[#allocation2 + $0xa4] ss:$16 sps:$4 sm:$0xff]  }
  0x4b   :  { %v2488_v12 = vld [vmem:[#allocation2 + $0xac] ss:$16 sps:$4 sm:$0xff]   ;;  %v2483_v13 = vld [vmem:[#allocation2 + $0xa0] ss:$16 sps:$4 sm:$0xff]   ;;  %v2486_v14 = vld [vmem:[#allocation2 + $0xa8] ss:$16 sps:$4 sm:$0xff]  }
  0x4c   :  { %561 = vmatpush1.bf16.msra.mxu0 %v2413_v26  ;;  %602 = vmatpush1.bf16.msra.mxu1 %v2414_v27  ;;  %v2491_v15 = vld [vmem:[#allocation2 + $0x84] ss:$16 sps:$4 sm:$0xff]   ;;  %v2494_v16 = vld [vmem:[#allocation2 + $0x8c] ss:$16 sps:$4 sm:$0xff]   ;;  %v2489_v17 = vld [vmem:[#allocation2 + $0x80] ss:$16 sps:$4 sm:$0xff]  }
  0x4d   :  { %562 = vmatprep.subr.bf16.mxu0 %v2415_v28  ;;  %603 = vmatprep.subr.bf16.mxu1 %v2417_v29  ;;  %v2492_v18 = vld [vmem:[#allocation2 + $0x88] ss:$16 sps:$4 sm:$0xff]   ;;  %v2497_v19 = vld [vmem:[#allocation2 + $0x64] ss:$16 sps:$4 sm:$0xff]   ;;  %v2500_v20 = vld [vmem:[#allocation2 + $0x6c] ss:$16 sps:$4 sm:$0xff]  }
  0x4e   :  { %v2495_v21 = vld [vmem:[#allocation2 + $0x60] ss:$16 sps:$4 sm:$0xff]   ;;  %v2498_v22 = vld [vmem:[#allocation2 + $0x68] ss:$16 sps:$4 sm:$0xff]   ;;  %v2503_v23 = vld [vmem:[#allocation2 + $0x44] ss:$16 sps:$4 sm:$0xff]  }
  0x4f   :  { %v2506_v24 = vld [vmem:[#allocation2 + $0x4c] ss:$16 sps:$4 sm:$0xff]   ;;  %v2501_v25 = vld [vmem:[#allocation2 + $0x40] ss:$16 sps:$4 sm:$0xff]   ;;  %v2504_v26 = vld [vmem:[#allocation2 + $0x48] ss:$16 sps:$4 sm:$0xff]  }
  0x50   :  { %563 = vmatpush1.bf16.msra.mxu0 %v2419_v30  ;;  %604 = vmatpush1.bf16.msra.mxu1 %v2420_v31  ;;  %v2509_v27 = vld [vmem:[#allocation2 + $0x24] ss:$16 sps:$4 sm:$0xff]   ;;  %v2512_v28 = vld [vmem:[#allocation2 + $0x2c] ss:$16 sps:$4 sm:$0xff]   ;;  %v2507_v30 = vld [vmem:[#allocation2 + $0x20] ss:$16 sps:$4 sm:$0xff]  }
  0x51   :  { %564 = vmatprep.subr.bf16.mxu0 %v2421_v32  ;;  %605 = vmatprep.subr.bf16.mxu1 %v2423_v33  ;;  %v89_v29 = vld [vmem:[%s3062_s0 + $0x8] sm:$0xff]  ;;  %v2515_v33 = vld [vmem:[#allocation2 + $0x4] ss:$16 sps:$4 sm:$0xff]  }
  0x52   :  { %v2510_v31 = vld [vmem:[#allocation2 + $0x28] ss:$16 sps:$4 sm:$0xff]   ;;  %v91_v32 = vpack.c.bf16 %v89_v29, %v89_v29  ;;  %v2536_v46 = vld [vmem:[#allocation2 + $0x1ac] ss:$16 sps:$4 sm:$0xff]  }
  0x53   :  { %v2605_v29 = vld [vmem:[#allocation8 + $0x4c] ss:$16 sps:$4 sm:$0xff]  }
  0x54   :  { %565 = vmatpush2.bf16.msra.mxu0 %v2425_v34  ;;  %606 = vmatpush2.bf16.msra.mxu1 %v2426_v35  ;;  %v2518_v34 = vld [vmem:[#allocation2 + $0xc] ss:$16 sps:$4 sm:$0xff]   ;;  %v2513_v35 = vld [vmem:[#allocation2] ss:$16 sps:$4 sm:$0xff]  }
  0x55   :  { %566 = vmatprep.subr.bf16.mxu0 %v2427_v36  ;;  %607 = vmatprep.subr.bf16.mxu1 %v2429_v37  ;;  %v2516_v36 = vld [vmem:[#allocation2 + $0x8] ss:$16 sps:$4 sm:$0xff]   ;;  %v2521_v37 = vld [vmem:[#allocation2 + $0x1e4] ss:$16 sps:$4 sm:$0xff]  }
  0x58   :  { %567 = vmatpush2.bf16.msra.mxu0 %v2431_v38  ;;  %608 = vmatpush2.bf16.msra.mxu1 %v2432_v39  ;;  %v2524_v38 = vld [vmem:[#allocation2 + $0x1ec] ss:$16 sps:$4 sm:$0xff]   ;;  %v2519_v39 = vld [vmem:[#allocation2 + $0x1e0] ss:$16 sps:$4 sm:$0xff]  }
  0x59   :  { %568 = vmatprep.subr.bf16.mxu0 %v2433_v40  ;;  %609 = vmatprep.subr.bf16.mxu1 %v2435_v41  ;;  %v2522_v40 = vld [vmem:[#allocation2 + $0x1e8] ss:$16 sps:$4 sm:$0xff]   ;;  %v2527_v41 = vld [vmem:[#allocation2 + $0x1c4] ss:$16 sps:$4 sm:$0xff]  }
  0x5c   :  { %569 = vmatpush2.bf16.msra.mxu0 %v2437_v42  ;;  %610 = vmatpush2.bf16.msra.mxu1 %v2438_v43  ;;  %v2530_v42 = vld [vmem:[#allocation2 + $0x1cc] ss:$16 sps:$4 sm:$0xff]   ;;  %v2525_v43 = vld [vmem:[#allocation2 + $0x1c0] ss:$16 sps:$4 sm:$0xff]  }
  0x5d   :  { %570 = vmatprep.subr.bf16.mxu0 %v2439_v44  ;;  %611 = vmatprep.subr.bf16.mxu1 %v2441_v45  ;;  %v2528_v44 = vld [vmem:[#allocation2 + $0x1c8] ss:$16 sps:$4 sm:$0xff]   ;;  %v2533_v45 = vld [vmem:[#allocation2 + $0x1a4] ss:$16 sps:$4 sm:$0xff]  }
  0x60   :  { %571 = vmatpush2.bf16.msra.mxu0 %v2443_v47  ;;  %612 = vmatpush2.bf16.msra.mxu1 %v2444_v49  ;;  %v2531_v47 = vld [vmem:[#allocation2 + $0x1a0] ss:$16 sps:$4 sm:$0xff]   ;;  %v2534_v49 = vld [vmem:[#allocation2 + $0x1a8] ss:$16 sps:$4 sm:$0xff]  }
  0x61   :  { %572 = vmatprep.subr.bf16.mxu0 %v2445_v50  ;;  %613 = vmatprep.subr.bf16.mxu1 %v2447_v51  ;;  %v2539_v50 = vld [vmem:[#allocation2 + $0x184] ss:$16 sps:$4 sm:$0xff]   ;;  %v2542_v51 = vld [vmem:[#allocation2 + $0x18c] ss:$16 sps:$4 sm:$0xff]  }
  0x64   :  { %573 = vmatpush2.bf16.msra.mxu0 %v2449_v52  ;;  %614 = vmatpush2.bf16.msra.mxu1 %v2450_v53  ;;  %v2537_v52 = vld [vmem:[#allocation2 + $0x180] ss:$16 sps:$4 sm:$0xff]   ;;  %v2540_v53 = vld [vmem:[#allocation2 + $0x188] ss:$16 sps:$4 sm:$0xff]  }
  0x65   :  { %574 = vmatprep.subr.bf16.mxu0 %v2451_v54  ;;  %615 = vmatprep.subr.bf16.mxu1 %v2453_v55  ;;  %v2545_v54 = vld [vmem:[#allocation2 + $0x164] ss:$16 sps:$4 sm:$0xff]   ;;  %v2548_v55 = vld [vmem:[#allocation2 + $0x16c] ss:$16 sps:$4 sm:$0xff]  }
  0x68   :  { %575 = vmatpush2.bf16.msra.mxu0 %v2455_v56  ;;  %616 = vmatpush2.bf16.msra.mxu1 %v2456_v57  ;;  %v2543_v56 = vld [vmem:[#allocation2 + $0x160] ss:$16 sps:$4 sm:$0xff]   ;;  %v2546_v57 = vld [vmem:[#allocation2 + $0x168] ss:$16 sps:$4 sm:$0xff]  }
  0x69   :  { %576 = vmatprep.subr.bf16.mxu0 %v2457_v58  ;;  %617 = vmatprep.subr.bf16.mxu1 %v2459_v59  ;;  %v2551_v58 = vld [vmem:[#allocation2 + $0x144] ss:$16 sps:$4 sm:$0xff]   ;;  %v2554_v59 = vld [vmem:[#allocation2 + $0x14c] ss:$16 sps:$4 sm:$0xff]  }
  0x6c   :  { %577 = vmatpush2.bf16.msra.mxu0 %v2461_v60  ;;  %618 = vmatpush2.bf16.msra.mxu1 %v2462_v61  ;;  %v2549_v60 = vld [vmem:[#allocation2 + $0x140] ss:$16 sps:$4 sm:$0xff]   ;;  %v2552_v61 = vld [vmem:[#allocation2 + $0x148] ss:$16 sps:$4 sm:$0xff]  }
  0x6d   :  { %578 = vmatprep.subr.bf16.mxu0 %v2463_v62  ;;  %619 = vmatprep.subr.bf16.mxu1 %v2465_v63  ;;  %v2557_v62 = vld [vmem:[#allocation2 + $0x124] ss:$16 sps:$4 sm:$0xff]   ;;  %v2560_v63 = vld [vmem:[#allocation2 + $0x12c] ss:$16 sps:$4 sm:$0xff]  }
  0x70   :  { %579 = vmatpush2.bf16.msra.mxu0 %v2467_v0  ;;  %620 = vmatpush2.bf16.msra.mxu1 %v2468_v1  ;;  %v2555_v0 = vld [vmem:[#allocation2 + $0x120] ss:$16 sps:$4 sm:$0xff]   ;;  %v2558_v1 = vld [vmem:[#allocation2 + $0x128] ss:$16 sps:$4 sm:$0xff]  }
  0x71   :  { %950 = vmatprep.subr.bf16.mxu0 %v2473_v2  ;;  %991 = vmatprep.subr.bf16.mxu1 %v2476_v3  ;;  %v2563_v2 = vld [vmem:[#allocation2 + $0x104] ss:$16 sps:$4 sm:$0xff]   ;;  %v2566_v3 = vld [vmem:[#allocation2 + $0x10c] ss:$16 sps:$4 sm:$0xff]  }
  0x73   :  { %581 = vmatmul.mubr.bf16.vlgmr.msra.gmra.mxu0 %v3003_v4  ;;  %622 = vmatmul.mubr.bf16.vlgmr.msra.gmra.mxu1 %v3003_v4 }
  0x74   :  { %951 = vmatpush1.bf16.msra.mxu0 %v2471_v5  ;;  %992 = vmatpush1.bf16.msra.mxu1 %v2474_v6  ;;  %v2561_v5 = vld [vmem:[#allocation2 + $0x100] ss:$16 sps:$4 sm:$0xff]   ;;  %v2564_v6 = vld [vmem:[#allocation2 + $0x108] ss:$16 sps:$4 sm:$0xff]  }
  0x75   :  { %952 = vmatprep.subr.bf16.mxu0 %v2479_v7  ;;  %993 = vmatprep.subr.bf16.mxu1 %v2482_v8  ;;  %v3013_v7 = vld [vmem:[%s3062_s0] sm:$0xff] }
  0x76   :  { %982 = vmatprep.mubr.bf16.mxu0 %v91_v32  ;;  %1023 = vmatprep.mubr.bf16.mxu1 %v91_v32  ;;  %v90_v8 = vpack.c.bf16 %v3013_v7, %v3013_v7  ;;  %v2603_v32 = vld [vmem:[#allocation8 + $0x48] ss:$16 sps:$4 sm:$0xff]  }
  0x78   :  { %953 = vmatpush1.bf16.msra.mxu0 %v2477_v9  ;;  %994 = vmatpush1.bf16.msra.mxu1 %v2480_v10  ;;  %v2567_v9 = vld [vmem:[#allocation8 + $0xe0] ss:$16 sps:$4 sm:$0xff]   ;;  %v2569_v10 = vld [vmem:[#allocation8 + $0xe4] ss:$16 sps:$4 sm:$0xff]  }
  0x79   :  { %954 = vmatprep.subr.bf16.mxu0 %v2485_v11  ;;  %995 = vmatprep.subr.bf16.mxu1 %v2488_v12  ;;  %v2572_v11 = vld [vmem:[#allocation8 + $0xc4] ss:$16 sps:$4 sm:$0xff]   ;;  %v2573_v12 = vld [vmem:[#allocation8 + $0xe8] ss:$16 sps:$4 sm:$0xff]  }
  0x7c   :  { %955 = vmatpush1.bf16.msra.mxu0 %v2483_v13  ;;  %996 = vmatpush1.bf16.msra.mxu1 %v2486_v14  ;;  %v2575_v13 = vld [vmem:[#allocation8 + $0xec] ss:$16 sps:$4 sm:$0xff]   ;;  %v2570_v14 = vld [vmem:[#allocation8 + $0xc0] ss:$16 sps:$4 sm:$0xff]  }
  0x7d   :  { %956 = vmatprep.subr.bf16.mxu0 %v2491_v15  ;;  %997 = vmatprep.subr.bf16.mxu1 %v2494_v16  ;;  %v2581_v15 = vld [vmem:[#allocation8 + $0xcc] ss:$16 sps:$4 sm:$0xff]   ;;  %v2578_v16 = vld [vmem:[#allocation8 + $0xa4] ss:$16 sps:$4 sm:$0xff]  }
  0x80   :  { %957 = vmatpush1.bf16.msra.mxu0 %v2489_v17  ;;  %998 = vmatpush1.bf16.msra.mxu1 %v2492_v18  ;;  %v2579_v17 = vld [vmem:[#allocation8 + $0xc8] ss:$16 sps:$4 sm:$0xff]   ;;  %v2587_v18 = vld [vmem:[#allocation8 + $0xac] ss:$16 sps:$4 sm:$0xff]  }
  0x81   :  { %958 = vmatprep.subr.bf16.mxu0 %v2497_v19  ;;  %999 = vmatprep.subr.bf16.mxu1 %v2500_v20  ;;  %v2576_v19 = vld [vmem:[#allocation8 + $0xa0] ss:$16 sps:$4 sm:$0xff]   ;;  %v2585_v20 = vld [vmem:[#allocation8 + $0xa8] ss:$16 sps:$4 sm:$0xff]  }
  0x84   :  { %959 = vmatpush1.bf16.msra.mxu0 %v2495_v21  ;;  %1000 = vmatpush1.bf16.msra.mxu1 %v2498_v22  ;;  %v2593_v21 = vld [vmem:[#allocation8 + $0x8c] ss:$16 sps:$4 sm:$0xff]   ;;  %v2582_v22 = vld [vmem:[#allocation8 + $0x80] ss:$16 sps:$4 sm:$0xff]  }
  0x85   :  { %960 = vmatprep.subr.bf16.mxu0 %v2503_v23  ;;  %1001 = vmatprep.subr.bf16.mxu1 %v2506_v24  ;;  %v2590_v23 = vld [vmem:[#allocation8 + $0x64] ss:$16 sps:$4 sm:$0xff]   ;;  %v2591_v24 = vld [vmem:[#allocation8 + $0x88] ss:$16 sps:$4 sm:$0xff]  }
  0x88   :  { %961 = vmatpush1.bf16.msra.mxu0 %v2501_v25  ;;  %1002 = vmatpush1.bf16.msra.mxu1 %v2504_v26  ;;  %v2599_v25 = vld [vmem:[#allocation8 + $0x6c] ss:$16 sps:$4 sm:$0xff]   ;;  %v2588_v26 = vld [vmem:[#allocation8 + $0x60] ss:$16 sps:$4 sm:$0xff]  }
  0x89   :  { %962 = vmatprep.subr.bf16.mxu0 %v2509_v27  ;;  %1003 = vmatprep.subr.bf16.mxu1 %v2512_v28  ;;  %v2596_v27 = vld [vmem:[#allocation8 + $0x44] ss:$16 sps:$4 sm:$0xff]   ;;  %v2597_v28 = vld [vmem:[#allocation8 + $0x68] ss:$16 sps:$4 sm:$0xff]  }
  0x8c   :  { %963 = vmatpush1.bf16.msra.mxu0 %v2507_v30  ;;  %1004 = vmatpush1.bf16.msra.mxu1 %v2510_v31  ;;  %v2594_v30 = vld [vmem:[#allocation8 + $0x40] ss:$16 sps:$4 sm:$0xff]   ;;  %v2602_v31 = vld [vmem:[#allocation8 + $0x24] ss:$16 sps:$4 sm:$0xff]  }
  0x8d   :  { %964 = vmatprep.subr.bf16.mxu0 %v2515_v33  ;;  %1005 = vmatprep.subr.bf16.mxu1 %v2518_v34  ;;  %v2611_v33 = vld [vmem:[#allocation8 + $0x2c] ss:$16 sps:$4 sm:$0xff]   ;;  %v2600_v34 = vld [vmem:[#allocation8 + $0x20] ss:$16 sps:$4 sm:$0xff]  }
  0x90   :  { %965 = vmatpush1.bf16.msra.mxu0 %v2513_v35  ;;  %1006 = vmatpush1.bf16.msra.mxu1 %v2516_v36  ;;  %v2608_v35 = vld [vmem:[#allocation8 + $0x4] ss:$16 sps:$4 sm:$0xff]   ;;  %v2609_v36 = vld [vmem:[#allocation8 + $0x28] ss:$16 sps:$4 sm:$0xff]  }
  0x91   :  { %966 = vmatprep.subr.bf16.mxu0 %v2521_v37  ;;  %1007 = vmatprep.subr.bf16.mxu1 %v2524_v38  ;;  %v2617_v37 = vld [vmem:[#allocation8 + $0xc] ss:$16 sps:$4 sm:$0xff]   ;;  %v2606_v38 = vld [vmem:[#allocation8] ss:$16 sps:$4 sm:$0xff]  }
  0x94   :  { %967 = vmatpush2.bf16.msra.mxu0 %v2519_v39  ;;  %1008 = vmatpush2.bf16.msra.mxu1 %v2522_v40  ;;  %v2614_v39 = vld [vmem:[#allocation8 + $0x1e4] ss:$16 sps:$4 sm:$0xff]   ;;  %v2615_v40 = vld [vmem:[#allocation8 + $0x8] ss:$16 sps:$4 sm:$0xff]  }
  0x95   :  { %968 = vmatprep.subr.bf16.mxu0 %v2527_v41  ;;  %1009 = vmatprep.subr.bf16.mxu1 %v2530_v42  ;;  %v2623_v41 = vld [vmem:[#allocation8 + $0x1ec] ss:$16 sps:$4 sm:$0xff]   ;;  %v2612_v42 = vld [vmem:[#allocation8 + $0x1e0] ss:$16 sps:$4 sm:$0xff]  }
  0x98   :  { %969 = vmatpush2.bf16.msra.mxu0 %v2525_v43  ;;  %1010 = vmatpush2.bf16.msra.mxu1 %v2528_v44  ;;  %v2620_v43 = vld [vmem:[#allocation8 + $0x1c4] ss:$16 sps:$4 sm:$0xff]   ;;  %v2621_v44 = vld [vmem:[#allocation8 + $0x1e8] ss:$16 sps:$4 sm:$0xff]  }
  0x99   :  { %970 = vmatprep.subr.bf16.mxu0 %v2533_v45  ;;  %1011 = vmatprep.subr.bf16.mxu1 %v2536_v46  ;;  %v2629_v45 = vld [vmem:[#allocation8 + $0x1cc] ss:$16 sps:$4 sm:$0xff]   ;;  %v2618_v46 = vld [vmem:[#allocation8 + $0x1c0] ss:$16 sps:$4 sm:$0xff]  }
  0x9c   :  { %971 = vmatpush2.bf16.msra.mxu0 %v2531_v47  ;;  %1012 = vmatpush2.bf16.msra.mxu1 %v2534_v49  ;;  %v2626_v47 = vld [vmem:[#allocation8 + $0x1a4] ss:$16 sps:$4 sm:$0xff]   ;;  %v2627_v49 = vld [vmem:[#allocation8 + $0x1c8] ss:$16 sps:$4 sm:$0xff]  }
  0x9d   :  { %972 = vmatprep.subr.bf16.mxu0 %v2539_v50  ;;  %1013 = vmatprep.subr.bf16.mxu1 %v2542_v51  ;;  %v2635_v50 = vld [vmem:[#allocation8 + $0x1ac] ss:$16 sps:$4 sm:$0xff]   ;;  %v2624_v51 = vld [vmem:[#allocation8 + $0x1a0] ss:$16 sps:$4 sm:$0xff]  }
  0xa0   :  { %973 = vmatpush2.bf16.msra.mxu0 %v2537_v52  ;;  %1014 = vmatpush2.bf16.msra.mxu1 %v2540_v53  ;;  %v2632_v52 = vld [vmem:[#allocation8 + $0x184] ss:$16 sps:$4 sm:$0xff]   ;;  %v2633_v53 = vld [vmem:[#allocation8 + $0x1a8] ss:$16 sps:$4 sm:$0xff]  }
  0xa1   :  { %974 = vmatprep.subr.bf16.mxu0 %v2545_v54  ;;  %1015 = vmatprep.subr.bf16.mxu1 %v2548_v55  ;;  %v2641_v54 = vld [vmem:[#allocation8 + $0x18c] ss:$16 sps:$4 sm:$0xff]   ;;  %v2630_v55 = vld [vmem:[#allocation8 + $0x180] ss:$16 sps:$4 sm:$0xff]  }
  0xa4   :  { %975 = vmatpush2.bf16.msra.mxu0 %v2543_v56  ;;  %1016 = vmatpush2.bf16.msra.mxu1 %v2546_v57  ;;  %v2638_v56 = vld [vmem:[#allocation8 + $0x164] ss:$16 sps:$4 sm:$0xff]   ;;  %v2639_v57 = vld [vmem:[#allocation8 + $0x188] ss:$16 sps:$4 sm:$0xff]  }
  0xa5   :  { %976 = vmatprep.subr.bf16.mxu0 %v2551_v58  ;;  %1017 = vmatprep.subr.bf16.mxu1 %v2554_v59  ;;  %v2636_v58 = vld [vmem:[#allocation8 + $0x160] ss:$16 sps:$4 sm:$0xff]   ;;  %v2644_v59 = vld [vmem:[#allocation8 + $0x144] ss:$16 sps:$4 sm:$0xff]  }
  0xa8   :  { %977 = vmatpush2.bf16.msra.mxu0 %v2549_v60  ;;  %1018 = vmatpush2.bf16.msra.mxu1 %v2552_v61  ;;  %v2642_v60 = vld [vmem:[#allocation8 + $0x140] ss:$16 sps:$4 sm:$0xff]   ;;  %v2647_v61 = vld [vmem:[#allocation8 + $0x16c] ss:$16 sps:$4 sm:$0xff]  }
  0xa9   :  { %978 = vmatprep.subr.bf16.mxu0 %v2557_v62  ;;  %1019 = vmatprep.subr.bf16.mxu1 %v2560_v63  ;;  %v2645_v62 = vld [vmem:[#allocation8 + $0x168] ss:$16 sps:$4 sm:$0xff]   ;;  %v2650_v63 = vld [vmem:[#allocation8 + $0x124] ss:$16 sps:$4 sm:$0xff]  }
  0xac   :  { %979 = vmatpush2.bf16.msra.mxu0 %v2555_v0  ;;  %1020 = vmatpush2.bf16.msra.mxu1 %v2558_v1  ;;  %v2648_v0 = vld [vmem:[#allocation8 + $0x120] ss:$16 sps:$4 sm:$0xff]   ;;  %v2653_v1 = vld [vmem:[#allocation8 + $0x14c] ss:$16 sps:$4 sm:$0xff]  }
  0xad   :  { %980 = vmatprep.subr.bf16.mxu0 %v2563_v2  ;;  %1021 = vmatprep.subr.bf16.mxu1 %v2566_v3  ;;  %v2651_v2 = vld [vmem:[#allocation8 + $0x148] ss:$16 sps:$4 sm:$0xff]   ;;  %v2656_v3 = vld [vmem:[#allocation8 + $0x104] ss:$16 sps:$4 sm:$0xff]  }
  0xb0   :  { %981 = vmatpush2.bf16.msra.mxu0 %v2561_v5  ;;  %1022 = vmatpush2.bf16.msra.mxu1 %v2564_v6  ;;  %v2654_v5 = vld [vmem:[#allocation8 + $0x100] ss:$16 sps:$4 sm:$0xff]   ;;  %v2659_v6 = vld [vmem:[#allocation8 + $0x12c] ss:$16 sps:$4 sm:$0xff]  }
  0xb1   :  { %1540 = vmatprep.subr.bf16.mxu0 %v2569_v10  ;;  %1581 = vmatprep.subr.bf16.mxu1 %v2575_v13  ;;  %v2660_v10 = vld [vmem:[#allocation8 + $0x108] ss:$16 sps:$4 sm:$0xff]   ;;  %v2663_v13 = vld [vmem:[#allocation7 + $0xe0] ss:$16 sps:$4 sm:$0xff]  }
  0xb3   :  { %983 = vmatmul.mubr.bf16.vlgmr.msra.gmra.mxu0 %v90_v8  ;;  %1024 = vmatmul.mubr.bf16.vlgmr.msra.gmra.mxu1 %v90_v8  ;;  %v2657_v8 = vld [vmem:[#allocation8 + $0x128] ss:$16 sps:$4 sm:$0xff]  }
  0xb4   :  { %1572 = vmatprep.mubr.bf16.mxu0 %v2999_v48  ;;  %1613 = vmatprep.mubr.bf16.mxu1 %v2999_v48  ;;  %v2584_v48 = vld [vmem:[#allocation8 + $0x84] ss:$16 sps:$4 sm:$0xff]  }
  0xb5   :  { %1541 = vmatpush1.bf16.msra.mxu0 %v2567_v9  ;;  %1582 = vmatpush1.bf16.msra.mxu1 %v2573_v12  ;;  %v2662_v9 = vld [vmem:[#allocation8 + $0x10c] ss:$16 sps:$4 sm:$0xff]  }
  0xb6   :  { %1542 = vmatprep.subr.bf16.mxu0 %v2572_v11  ;;  %1583 = vmatprep.subr.bf16.mxu1 %v2581_v15  ;;  %v2665_v11 = vld [vmem:[#allocation7 + $0xe4] ss:$16 sps:$4 sm:$0xff]   ;;  %v2668_v12 = vld [vmem:[#allocation7 + $0xec] ss:$16 sps:$4 sm:$0xff]  }
  0xb7   :  { %v2671_v15 = vld [vmem:[#allocation7 + $0xc4] ss:$16 sps:$4 sm:$0xff]  }
  0xb9   :  { %1543 = vmatpush1.bf16.msra.mxu0 %v2570_v14  ;;  %1584 = vmatpush1.bf16.msra.mxu1 %v2579_v17  ;;  %v2666_v14 = vld [vmem:[#allocation7 + $0xe8] ss:$16 sps:$4 sm:$0xff]   ;;  %v2669_v17 = vld [vmem:[#allocation7 + $0xc0] ss:$16 sps:$4 sm:$0xff]  }
  0xba   :  { %1544 = vmatprep.subr.bf16.mxu0 %v2578_v16  ;;  %1585 = vmatprep.subr.bf16.mxu1 %v2587_v18  ;;  %v2674_v16 = vld [vmem:[#allocation7 + $0xcc] ss:$16 sps:$4 sm:$0xff]   ;;  %v2672_v18 = vld [vmem:[#allocation7 + $0xc8] ss:$16 sps:$4 sm:$0xff]  }
  0xbd   :  { %1545 = vmatpush1.bf16.msra.mxu0 %v2576_v19  ;;  %1586 = vmatpush1.bf16.msra.mxu1 %v2585_v20  ;;  %v2677_v19 = vld [vmem:[#allocation7 + $0xa4] ss:$16 sps:$4 sm:$0xff]   ;;  %v2675_v20 = vld [vmem:[#allocation7 + $0xa0] ss:$16 sps:$4 sm:$0xff]  }
  0xbe   :  { %1546 = vmatprep.subr.bf16.mxu0 %v2584_v48  ;;  %1587 = vmatprep.subr.bf16.mxu1 %v2593_v21  ;;  %v2680_v48 = vld [vmem:[#allocation7 + $0xac] ss:$16 sps:$4 sm:$0xff]   ;;  %v2678_v21 = vld [vmem:[#allocation7 + $0xa8] ss:$16 sps:$4 sm:$0xff]  }
  0xc1   :  { %1547 = vmatpush1.bf16.msra.mxu0 %v2582_v22  ;;  %1588 = vmatpush1.bf16.msra.mxu1 %v2591_v24  ;;  %v2683_v22 = vld [vmem:[#allocation7 + $0x84] ss:$16 sps:$4 sm:$0xff]   ;;  %v2684_v24 = vld [vmem:[#allocation7 + $0x88] ss:$16 sps:$4 sm:$0xff]  }
  0xc2   :  { %1548 = vmatprep.subr.bf16.mxu0 %v2590_v23  ;;  %1589 = vmatprep.subr.bf16.mxu1 %v2599_v25  ;;  %v2681_v23 = vld [vmem:[#allocation7 + $0x80] ss:$16 sps:$4 sm:$0xff]   ;;  %v2689_v25 = vld [vmem:[#allocation7 + $0x64] ss:$16 sps:$4 sm:$0xff]  }
  0xc5   :  { %1549 = vmatpush1.bf16.msra.mxu0 %v2588_v26  ;;  %1590 = vmatpush1.bf16.msra.mxu1 %v2597_v28  ;;  %v2692_v26 = vld [vmem:[#allocation7 + $0x6c] ss:$16 sps:$4 sm:$0xff]   ;;  %v2690_v28 = vld [vmem:[#allocation7 + $0x68] ss:$16 sps:$4 sm:$0xff]  }
  0xc6   :  { %1550 = vmatprep.subr.bf16.mxu0 %v2596_v27  ;;  %1591 = vmatprep.subr.bf16.mxu1 %v2605_v29  ;;  %v2687_v27 = vld [vmem:[#allocation7 + $0x60] ss:$16 sps:$4 sm:$0xff]   ;;  %v2695_v29 = vld [vmem:[#allocation7 + $0x44] ss:$16 sps:$4 sm:$0xff]  }
  0xc9   :  { %1551 = vmatpush1.bf16.msra.mxu0 %v2594_v30  ;;  %1592 = vmatpush1.bf16.msra.mxu1 %v2603_v32  ;;  %v2698_v30 = vld [vmem:[#allocation7 + $0x4c] ss:$16 sps:$4 sm:$0xff]   ;;  %v2696_v32 = vld [vmem:[#allocation7 + $0x48] ss:$16 sps:$4 sm:$0xff]  }
  0xca   :  { %1552 = vmatprep.subr.bf16.mxu0 %v2602_v31  ;;  %1593 = vmatprep.subr.bf16.mxu1 %v2611_v33  ;;  %v2693_v31 = vld [vmem:[#allocation7 + $0x40] ss:$16 sps:$4 sm:$0xff]   ;;  %v2701_v33 = vld [vmem:[#allocation7 + $0x24] ss:$16 sps:$4 sm:$0xff]  }
  0xcd   :  { %1553 = vmatpush1.bf16.msra.mxu0 %v2600_v34  ;;  %1594 = vmatpush1.bf16.msra.mxu1 %v2609_v36  ;;  %v2704_v34 = vld [vmem:[#allocation7 + $0x2c] ss:$16 sps:$4 sm:$0xff]   ;;  %v2702_v36 = vld [vmem:[#allocation7 + $0x28] ss:$16 sps:$4 sm:$0xff]  }
  0xce   :  { %1554 = vmatprep.subr.bf16.mxu0 %v2608_v35  ;;  %1595 = vmatprep.subr.bf16.mxu1 %v2617_v37  ;;  %v2699_v35 = vld [vmem:[#allocation7 + $0x20] ss:$16 sps:$4 sm:$0xff]   ;;  %v2707_v37 = vld [vmem:[#allocation7 + $0x4] ss:$16 sps:$4 sm:$0xff]  }
  0xd1   :  { %1555 = vmatpush1.bf16.msra.mxu0 %v2606_v38  ;;  %1596 = vmatpush1.bf16.msra.mxu1 %v2615_v40  ;;  %v2710_v38 = vld [vmem:[#allocation7 + $0xc] ss:$16 sps:$4 sm:$0xff]   ;;  %v2708_v40 = vld [vmem:[#allocation7 + $0x8] ss:$16 sps:$4 sm:$0xff]  }
  0xd2   :  { %1556 = vmatprep.subr.bf16.mxu0 %v2614_v39  ;;  %1597 = vmatprep.subr.bf16.mxu1 %v2623_v41  ;;  %v2705_v39 = vld [vmem:[#allocation7] ss:$16 sps:$4 sm:$0xff]   ;;  %v2713_v41 = vld [vmem:[#allocation7 + $0x1e4] ss:$16 sps:$4 sm:$0xff]  }
  0xd5   :  { %1557 = vmatpush2.bf16.msra.mxu0 %v2612_v42  ;;  %1598 = vmatpush2.bf16.msra.mxu1 %v2621_v44  ;;  %v2716_v42 = vld [vmem:[#allocation7 + $0x1ec] ss:$16 sps:$4 sm:$0xff]   ;;  %v2714_v44 = vld [vmem:[#allocation7 + $0x1e8] ss:$16 sps:$4 sm:$0xff]  }
  0xd6   :  { %1558 = vmatprep.subr.bf16.mxu0 %v2620_v43  ;;  %1599 = vmatprep.subr.bf16.mxu1 %v2629_v45  ;;  %v2711_v43 = vld [vmem:[#allocation7 + $0x1e0] ss:$16 sps:$4 sm:$0xff]   ;;  %v2719_v45 = vld [vmem:[#allocation7 + $0x1c4] ss:$16 sps:$4 sm:$0xff]  }
  0xd9   :  { %1559 = vmatpush2.bf16.msra.mxu0 %v2618_v46  ;;  %1600 = vmatpush2.bf16.msra.mxu1 %v2627_v49  ;;  %v2722_v46 = vld [vmem:[#allocation7 + $0x1cc] ss:$16 sps:$4 sm:$0xff]   ;;  %v2720_v49 = vld [vmem:[#allocation7 + $0x1c8] ss:$16 sps:$4 sm:$0xff]  }
  0xda   :  { %1560 = vmatprep.subr.bf16.mxu0 %v2626_v47  ;;  %1601 = vmatprep.subr.bf16.mxu1 %v2635_v50  ;;  %v2717_v47 = vld [vmem:[#allocation7 + $0x1c0] ss:$16 sps:$4 sm:$0xff]   ;;  %v2725_v50 = vld [vmem:[#allocation7 + $0x1a4] ss:$16 sps:$4 sm:$0xff]  }
  0xdd   :  { %1561 = vmatpush2.bf16.msra.mxu0 %v2624_v51  ;;  %1602 = vmatpush2.bf16.msra.mxu1 %v2633_v53  ;;  %v2728_v51 = vld [vmem:[#allocation7 + $0x1ac] ss:$16 sps:$4 sm:$0xff]   ;;  %v2726_v53 = vld [vmem:[#allocation7 + $0x1a8] ss:$16 sps:$4 sm:$0xff]  }
  0xde   :  { %1562 = vmatprep.subr.bf16.mxu0 %v2632_v52  ;;  %1603 = vmatprep.subr.bf16.mxu1 %v2641_v54  ;;  %v2723_v52 = vld [vmem:[#allocation7 + $0x1a0] ss:$16 sps:$4 sm:$0xff]   ;;  %v2731_v54 = vld [vmem:[#allocation7 + $0x184] ss:$16 sps:$4 sm:$0xff]  }
  0xe1   :  { %1563 = vmatpush2.bf16.msra.mxu0 %v2630_v55  ;;  %1604 = vmatpush2.bf16.msra.mxu1 %v2639_v57  ;;  %v2734_v55 = vld [vmem:[#allocation7 + $0x18c] ss:$16 sps:$4 sm:$0xff]   ;;  %v2732_v57 = vld [vmem:[#allocation7 + $0x188] ss:$16 sps:$4 sm:$0xff]  }
  0xe2   :  { %1564 = vmatprep.subr.bf16.mxu0 %v2638_v56  ;;  %1605 = vmatprep.subr.bf16.mxu1 %v2647_v61  ;;  %v2729_v56 = vld [vmem:[#allocation7 + $0x180] ss:$16 sps:$4 sm:$0xff]   ;;  %v2740_v61 = vld [vmem:[#allocation7 + $0x16c] ss:$16 sps:$4 sm:$0xff]  }
  0xe5   :  { %1565 = vmatpush2.bf16.msra.mxu0 %v2636_v58  ;;  %1606 = vmatpush2.bf16.msra.mxu1 %v2645_v62  ;;  %v2735_v58 = vld [vmem:[#allocation7 + $0x160] ss:$16 sps:$4 sm:$0xff]   ;;  %v2743_v62 = vld [vmem:[#allocation7 + $0x144] ss:$16 sps:$4 sm:$0xff]  }
  0xe6   :  { %1566 = vmatprep.subr.bf16.mxu0 %v2644_v59  ;;  %1607 = vmatprep.subr.bf16.mxu1 %v2653_v1  ;;  %v2737_v59 = vld [vmem:[#allocation7 + $0x164] ss:$16 sps:$4 sm:$0xff]  }
  0xe9   :  { %1567 = vmatpush2.bf16.msra.mxu0 %v2642_v60  ;;  %1608 = vmatpush2.bf16.msra.mxu1 %v2651_v2  ;;  %v2738_v60 = vld [vmem:[#allocation7 + $0x168] ss:$16 sps:$4 sm:$0xff]   ;;  %v2741_v2 = vld [vmem:[#allocation7 + $0x140] ss:$16 sps:$4 sm:$0xff]  }
  0xea   :  { %1568 = vmatprep.subr.bf16.mxu0 %v2650_v63  ;;  %1609 = vmatprep.subr.bf16.mxu1 %v2659_v6  ;;  %v2746_v63 = vld [vmem:[#allocation7 + $0x14c] ss:$16 sps:$4 sm:$0xff]   ;;  %v2744_v6 = vld [vmem:[#allocation7 + $0x148] ss:$16 sps:$4 sm:$0xff]  }
  0xed   :  { %1569 = vmatpush2.bf16.msra.mxu0 %v2648_v0  ;;  %1610 = vmatpush2.bf16.msra.mxu1 %v2657_v8  ;;  %v2749_v8 = vld [vmem:[#allocation7 + $0x124] ss:$16 sps:$4 sm:$0xff]  }
  0xee   :  { %1570 = vmatprep.subr.bf16.mxu0 %v2656_v3  ;;  %1611 = vmatprep.subr.bf16.mxu1 %v2662_v9  ;;  %v2752_v9 = vld [vmem:[#allocation7 + $0x12c] ss:$16 sps:$4 sm:$0xff]  }
  0xf1   :  { %1571 = vmatpush2.bf16.msra.mxu0 %v2654_v5  ;;  %1612 = vmatpush2.bf16.msra.mxu1 %v2660_v10 }
  0xf2   :  { %1942 = vmatprep.subr.bf16.mxu0 %v2665_v11  ;;  %1983 = vmatprep.subr.bf16.mxu1 %v2668_v12  ;;  %v2747_v12 = vld [vmem:[#allocation7 + $0x120] ss:$16 sps:$4 sm:$0xff]  }
  0xf4   :  { %1573 = vmatmul.mubr.bf16.vlgmr.msra.gmra.mxu0 %v3003_v4  ;;  %1614 = vmatmul.mubr.bf16.vlgmr.msra.gmra.mxu1 %v3003_v4  ;;  %v2686_v4 = vld [vmem:[#allocation7 + $0x8c] ss:$16 sps:$4 sm:$0xff]  }
  0xf5   :  { %1943 = vmatpush1.bf16.msra.mxu0 %v2663_v13  ;;  %1984 = vmatpush1.bf16.msra.mxu1 %v2666_v14 }
  0xf6   :  { %1944 = vmatprep.subr.bf16.mxu0 %v2671_v15  ;;  %1985 = vmatprep.subr.bf16.mxu1 %v2674_v16  ;;  %v2750_v15 = vld [vmem:[#allocation7 + $0x128] ss:$16 sps:$4 sm:$0xff]   ;;  %v2755_v16 = vld [vmem:[#allocation7 + $0x104] ss:$16 sps:$4 sm:$0xff]  }
  0xf9   :  { %1945 = vmatpush1.bf16.msra.mxu0 %v2669_v17  ;;  %1986 = vmatpush1.bf16.msra.mxu1 %v2672_v18  ;;  %v2758_v17 = vld [vmem:[#allocation7 + $0x10c] ss:$16 sps:$4 sm:$0xff]   ;;  %v2753_v18 = vld [vmem:[#allocation7 + $0x100] ss:$16 sps:$4 sm:$0xff]  }
  0xfa   :  { %1946 = vmatprep.subr.bf16.mxu0 %v2677_v19  ;;  %1987 = vmatprep.subr.bf16.mxu1 %v2680_v48  ;;  %v2756_v19 = vld [vmem:[#allocation7 + $0x108] ss:$16 sps:$4 sm:$0xff]   ;;  %v1034_v48 = vlaneseq }
  0xfd   :  { %1947 = vmatpush1.bf16.msra.mxu0 %v2675_v20  ;;  %1988 = vmatpush1.bf16.msra.mxu1 %v2678_v21  ;;  %v3023_v20 = vshrl.u32 %v1034_v48, 7 }
  0xfe   :  { %1948 = vmatprep.subr.bf16.mxu0 %v2683_v22  ;;  %1989 = vmatprep.subr.bf16.mxu1 %v2686_v4  ;;  %v1032_v22 = vld [vmem:[%s3066_s4] sm:$0xf]  ;;  %s2920_s4 = smov [#allocation11]  }
  0xff   :  { %v1036_v21 = vsub.s32 0, %v3023_v20  ;;  %v1040_v4 = vsub.s32 1, %v3023_v20  ;;  %s2086_s13 = sshll.u32 %s2920_s4, 4  ;;  %s2087_s13 = int_to_ptr.vmem [resolvable:$true] %s2086_s13 }
 0x100   :  { %s2864_s14 = scalar_lea.vmem %s2087_s13, 256  ;;  %p2869_p7 = scmp.lt.s32.totalorder %s2087_s13, %s2087_s13 }
 0x101   :  { %1949 = vmatpush1.bf16.msra.mxu0 %v2681_v23  ;;  %1990 = vmatpush1.bf16.msra.mxu1 %v2684_v24  ;;  %v1037_v23 = vrot.slane %v1032_v22, %v1036_v21  ;;  %p2865_p6 = scmp.ne.s32.totalorder %s2087_s13, %s2864_s14  ;;  %p2870_p8 = scmp.lt.s32.totalorder %s2864_s14, %s2864_s14 }
 0x102   :  { %1950 = vmatprep.subr.bf16.mxu0 %v2689_v25  ;;  %1991 = vmatprep.subr.bf16.mxu1 %v2692_v26 }
 0x103   :  { %p2871_p9 = por %p2870_p8, %p2869_p7 }
 0x105   :  { %1951 = vmatpush1.bf16.msra.mxu0 %v2687_v27  ;;  %1992 = vmatpush1.bf16.msra.mxu1 %v2690_v28  ;;  %v1041_v27 = vrot.slane %v1032_v22, %v1040_v4  ;;  %p2872_p10 = pnand %p2871_p9, %p2865_p6 }
 0x106   :  { %1952 = vmatprep.subr.bf16.mxu0 %v2695_v29  ;;  %1993 = vmatprep.subr.bf16.mxu1 %v2698_v30 }
 0x109   :  { %1953 = vmatpush1.bf16.msra.mxu0 %v2693_v31  ;;  %1994 = vmatpush1.bf16.msra.mxu1 %v2696_v32 }
 0x10a   :  { %1954 = vmatprep.subr.bf16.mxu0 %v2701_v33  ;;  %1995 = vmatprep.subr.bf16.mxu1 %v2704_v34 }
 0x10d   :  { %1955 = vmatpush1.bf16.msra.mxu0 %v2699_v35  ;;  %1996 = vmatpush1.bf16.msra.mxu1 %v2702_v36 }
 0x10e   :  { %1956 = vmatprep.subr.bf16.mxu0 %v2707_v37  ;;  %1997 = vmatprep.subr.bf16.mxu1 %v2710_v38 }
 0x111   :  { %1957 = vmatpush1.bf16.msra.mxu0 %v2705_v39  ;;  %1998 = vmatpush1.bf16.msra.mxu1 %v2708_v40 }
 0x112   :  { %1958 = vmatprep.subr.bf16.mxu0 %v2713_v41  ;;  %1999 = vmatprep.subr.bf16.mxu1 %v2716_v42 }
 0x115   :  { %1959 = vmatpush2.bf16.msra.mxu0 %v2711_v43  ;;  %2000 = vmatpush2.bf16.msra.mxu1 %v2714_v44  ;;  %v1044_v43 = vsub.s32 2, %v3023_v20  ;;  %v1048_v44 = vsub.s32 3, %v3023_v20 }
 0x116   :  { %1960 = vmatprep.subr.bf16.mxu0 %v2719_v45  ;;  %2001 = vmatprep.subr.bf16.mxu1 %v2722_v46 }
 0x117   :  { %v1045_v46 = vrot.slane %v1032_v22, %v1044_v43 }
 0x119   :  { %1961 = vmatpush2.bf16.msra.mxu0 %v2717_v47  ;;  %2002 = vmatpush2.bf16.msra.mxu1 %v2720_v49  ;;  %v1049_v49 = vrot.slane %v1032_v22, %v1048_v44 }
 0x11a   :  { %1962 = vmatprep.subr.bf16.mxu0 %v2725_v50  ;;  %2003 = vmatprep.subr.bf16.mxu1 %v2728_v51 }
 0x11d   :  { %1963 = vmatpush2.bf16.msra.mxu0 %v2723_v52  ;;  %2004 = vmatpush2.bf16.msra.mxu1 %v2726_v53 }
 0x11e   :  { %1964 = vmatprep.subr.bf16.mxu0 %v2731_v54  ;;  %2005 = vmatprep.subr.bf16.mxu1 %v2734_v55 }
 0x121   :  { %1965 = vmatpush2.bf16.msra.mxu0 %v2729_v56  ;;  %2006 = vmatpush2.bf16.msra.mxu1 %v2732_v57 }
 0x122   :  { %1966 = vmatprep.subr.bf16.mxu0 %v2737_v59  ;;  %2007 = vmatprep.subr.bf16.mxu1 %v2740_v61 }
 0x125   :  { %1967 = vmatpush2.bf16.msra.mxu0 %v2735_v58  ;;  %2008 = vmatpush2.bf16.msra.mxu1 %v2738_v60 }
 0x126   :  { %1968 = vmatprep.subr.bf16.mxu0 %v2743_v62  ;;  %2009 = vmatprep.subr.bf16.mxu1 %v2746_v63 }
 0x129   :  { %1969 = vmatpush2.bf16.msra.mxu0 %v2741_v2  ;;  %2010 = vmatpush2.bf16.msra.mxu1 %v2744_v6 }
 0x12a   :  { %1970 = vmatprep.subr.bf16.mxu0 %v2749_v8  ;;  %2011 = vmatprep.subr.bf16.mxu1 %v2752_v9 }
 0x12d   :  { %1971 = vmatpush2.bf16.msra.mxu0 %v2747_v12  ;;  %2012 = vmatpush2.bf16.msra.mxu1 %v2750_v15 }
 0x12e   :  { %1972 = vmatprep.subr.bf16.mxu0 %v2755_v16  ;;  %2013 = vmatprep.subr.bf16.mxu1 %v2758_v17 }
 0x131   :  { %1973 = vmatpush2.bf16.msra.mxu0 %v2753_v18  ;;  %2014 = vmatpush2.bf16.msra.mxu1 %v2756_v19 }
 0x133   :  { %v582_v0 = vpop.f32.mrf.mxu0  ;;  %v3021_v1 = vpop.f32.mrf.mxu1 }
 0x135   :  { %v584_v3 = vpop.f32.mrf.mxu0  ;;  %v625_v5 = vpop.f32.mrf.mxu1 }
 0x137   :  { %v586_v10 = vpop.f32.mrf.mxu0  ;;  %v627_v11 = vpop.f32.mrf.mxu1 }
 0x139   :  { %v587_v13 = vpop.f32.mrf.mxu0  ;;  %v628_v14 = vpop.f32.mrf.mxu1 }
 0x173   :  { %v984_v24 = vpop.f32.mrf.mxu0  ;;  %v1025_v25 = vpop.f32.mrf.mxu1 }
 0x174   :  { %v985_v26 = vadd.f32 %v984_v24, %v582_v0  ;;  %v1026_v45 = vadd.f32 %v1025_v25, %v3021_v1 }
 0x175   :  { %v986_v28 = vpop.f32.mrf.mxu0  ;;  %v1027_v29 = vpop.f32.mrf.mxu1 }
 0x176   :  { %v1054_v30 = vadd.f32 %v1037_v23, %v985_v26  ;;  %v987_v31 = vadd.f32 %v986_v28, %v584_v3  ;;  %v1028_v47 = vadd.f32 %v1027_v29, %v625_v5  ;;  %v1056_v52 = vadd.f32 %v1045_v46, %v1026_v45 }
 0x177   :  { %v988_v32 = vpop.f32.mrf.mxu0  ;;  %v1029_v33 = vpop.f32.mrf.mxu1 }
 0x178   :  { %v2231_v34 = vmul.f32 -1.442695, %v1054_v30  ;;  %v1055_v35 = vadd.f32 %v1041_v27, %v987_v31  ;;  %v1057_v56 = vadd.f32 %v1049_v49, %v1028_v47 }
 0x179   :  { %v989_v36 = vpop.f32.mrf.mxu0  ;;  %v1030_v37 = vpop.f32.mrf.mxu1 }
 0x17a   :  { %2759 = vpow2.f32 %v2231_v34  ;;  %v2232_v38 = vmul.f32 -1.442695, %v1055_v35 }
 0x17c   :  { %2761 = vpow2.f32 %v2232_v38 }
 0x187   :  { %v2760_v39 = vpop.eup %2759 }
 0x188   :  { %v1064_v40 = vadd.f32 1.0, %v2760_v39 }
 0x189   :  { %v2762_v41 = vpop.eup %2761 }
 0x18a   :  { %2763 = vrcp.f32 %v1064_v40  ;;  %v1065_v42 = vadd.f32 1.0, %v2762_v41 }
 0x18c   :  { %2765 = vrcp.f32 %v1065_v42 }
 0x197   :  { %v2764_v50 = vpop.eup %2763 }
 0x198   :  { %v1070_v51 = vmul.f32 %v2764_v50, %v1054_v30 }
 0x199   :  { %v2766_v53 = vpop.eup %2765 }
 0x19a   :  { %v1072_v54 = vmul.f32 %v1070_v51, %v1056_v52  ;;  %v1071_v55 = vmul.f32 %v2766_v53, %v1055_v35 }
 0x19c   :  { %v2233_v57 = vmul.f32 -1.442695, %v1072_v54  ;;  %1074 = vst [vmem:[#allocation11] sm:$0xff] %v1072_v54  ;;  %v1073_v58 = vmul.f32 %v1071_v55, %v1057_v56 }
 0x19e   :  { %2767 = vpow2.f32 %v2233_v57  ;;  %v2234_v59 = vmul.f32 -1.442695, %v1073_v58  ;;  %1075 = vst [vmem:[#allocation11 + $0x8] sm:$0xff] %v1073_v58 }
 0x1a0   :  { %2769 = vpow2.f32 %v2234_v59 }
 0x1ab   :  { %v2768_v60 = vpop.eup %2767 }
 0x1ac   :  { %v1082_v61 = vadd.f32 1.0, %v2768_v60 }
 0x1ad   :  { %v2770_v62 = vpop.eup %2769 }
 0x1ae   :  { %2771 = vrcp.f32 %v1082_v61  ;;  %v1083_v63 = vadd.f32 1.0, %v2770_v62 }
 0x1b0   :  { %2773 = vrcp.f32 %v1083_v63 }
 0x1b4   :  { %v1574_v5 = vpop.f32.mrf.mxu0  ;;  %v1615_v12 = vpop.f32.mrf.mxu1 }
 0x1b6   :  { %v1576_v8 = vpop.f32.mrf.mxu0  ;;  %v1617_v13 = vpop.f32.mrf.mxu1 }
 0x1b8   :  { %v1578_v10 = vpop.f32.mrf.mxu0  ;;  %v1619_v14 = vpop.f32.mrf.mxu1 }
 0x1ba   :  { %v1579_v11 = vpop.f32.mrf.mxu0  ;;  %v1620_v15 = vpop.f32.mrf.mxu1 }
 0x1bb   :  { %v2772_v0 = vpop.eup %2771 }
 0x1bc   :  { %v1088_v2 = vmul.f32 %v2772_v0, %v1072_v54 }
 0x1bd   :  { %v2774_v1 = vpop.eup %2773 }
 0x1be   :  { %v1089_v3 = vmul.f32 %v2774_v1, %v1073_v58  ;;  %v1090_v9 = vpack.c.bf16 %v1088_v2, %v1088_v2 }
 0x1c0   :  { %v1091_v6 = vpack.c.bf16 %v1089_v3, %v1089_v3 }
 0x1c2   :  { %1974 = vmatprep.mubr.bf16.mxu0 %v1091_v6  ;;  %2015 = vmatprep.mubr.bf16.mxu1 %v1091_v6 }
 0x1c3   :  { %1975 = vmatmul.mubr.bf16.vlgmr.msra.gmra.mxu0 %v1090_v9  ;;  %2016 = vmatmul.mubr.bf16.vlgmr.msra.gmra.mxu1 %v1090_v9 }
 0x1c4   :  { %2875 = shalt.err (!%p2872_p10)
}
 0x1c5   :  { %2089 = dma.vmem_to_hbm [thread:$0]  %s2087_s13, 256, %s3071_s9, [#allocation12]   ;;  %v2024_v16 = vld [vmem:[%s3069_s7] sm:$0xf] }
 0x1c6   :  { %v2029_v17 = vrot.slane %v2024_v16, %v1036_v21  ;;  %v2033_v22 = vrot.slane %v2024_v16, %v1040_v4  ;;  %v2037_v37 = vrot.slane %v2024_v16, %v1044_v43  ;;  %v2041_v39 = vrot.slane %v2024_v16, %v1048_v44  ;;  %s2921_s7 = smov [#allocation10]   ;;  %v2783_v43 = vld [vmem:[%s3062_s0 + $0x8] sm:$0xff] }
 0x1c7   :  { %s2076_s9 = sshll.u32 %s2921_s7, 4  ;;  %s2077_s9 = int_to_ptr.vmem [resolvable:$true] %s2076_s9 }
 0x1c8   :  { %s2884_s21 = scalar_lea.vmem %s2077_s9, 256  ;;  %p2889_p12 = scmp.lt.s32.totalorder %s2077_s9, %s2077_s9 }
 0x1c9   :  { %p2885_p11 = scmp.ne.s32.totalorder %s2077_s9, %s2884_s21  ;;  %p2890_p13 = scmp.lt.s32.totalorder %s2884_s21, %s2884_s21 }
 0x1cb   :  { %p2891_p0 = por %p2890_p13, %p2889_p12 }
 0x1cd   :  { %p2892_p1 = pnand %p2891_p0, %p2885_p11 }
 0x283   :  { %v1976_v18 = vpop.f32.mrf.mxu0  ;;  %v2017_v19 = vpop.f32.mrf.mxu1 }
 0x284   :  { %v1977_v48 = vadd.f32 %v1976_v18, %v1574_v5  ;;  %v2018_v4 = vadd.f32 %v2017_v19, %v1615_v12 }
 0x285   :  { %v1978_v23 = vpop.f32.mrf.mxu0  ;;  %v2019_v24 = vpop.f32.mrf.mxu1 }
 0x286   :  { %v2046_v25 = vadd.f32 %v2029_v17, %v1977_v48  ;;  %v1979_v26 = vadd.f32 %v1978_v23, %v1576_v8  ;;  %v2020_v38 = vadd.f32 %v2019_v24, %v1617_v13  ;;  %v2048_v42 = vadd.f32 %v2037_v37, %v2018_v4 }
 0x287   :  { %v1980_v27 = vpop.f32.mrf.mxu0  ;;  %v2021_v28 = vpop.f32.mrf.mxu1 }
 0x288   :  { %v2363_v29 = vmul.f32 -1.442695, %v2046_v25  ;;  %v2047_v30 = vadd.f32 %v2033_v22, %v1979_v26  ;;  %v2049_v49 = vadd.f32 %v2041_v39, %v2020_v38 }
 0x289   :  { %v1981_v31 = vpop.f32.mrf.mxu0  ;;  %v2022_v32 = vpop.f32.mrf.mxu1 }
 0x28a   :  { %2775 = vpow2.f32 %v2363_v29  ;;  %v2364_v33 = vmul.f32 -1.442695, %v2047_v30 }
 0x28c   :  { %2777 = vpow2.f32 %v2364_v33 }
 0x297   :  { %v2776_v21 = vpop.eup %2775 }
 0x298   :  { %v2056_v34 = vadd.f32 1.0, %v2776_v21 }
 0x299   :  { %v2778_v35 = vpop.eup %2777 }
 0x29a   :  { %2779 = vrcp.f32 %v2056_v34  ;;  %v2057_v36 = vadd.f32 1.0, %v2778_v35 }
 0x29c   :  { %2781 = vrcp.f32 %v2057_v36 }
 0x2a7   :  { %v2780_v40 = vpop.eup %2779 }
 0x2a8   :  { %v2062_v41 = vmul.f32 %v2780_v40, %v2046_v25 }
 0x2a9   :  { %v2782_v45 = vpop.eup %2781 }
 0x2aa   :  { %v2064_v46 = vmul.f32 %v2062_v41, %v2048_v42  ;;  %v2063_v47 = vmul.f32 %v2782_v45, %v2047_v30 }
 0x2ac   :  { %v2065_v50 = vmul.f32 %v2063_v47, %v2049_v49  ;;  %v2066_v51 = vadd.f32 %v2064_v46, %v3013_v7 }
 0x2ae   :  { %v2067_v52 = vadd.f32 %v2783_v43, %v2065_v50  ;;  %2068 = vst [vmem:[#allocation10] sm:$0xff] %v2066_v51 }
 0x2b0   :  { %2069 = vst [vmem:[#allocation10 + $0x8] sm:$0xff] %v2067_v52 }
 0x2b1   :  { %2895 = shalt.err (!%p2892_p1)
}
 0x2b2   :  { %2079 = dma.vmem_to_hbm [thread:$0]  %s2077_s9, 256, %s3070_s8, [#allocation4]  }
 0x2b3   :  { %2910 = dma.done.wait [#allocation4], 256  }
 0x2b4   :  { %2911 = vsyncadd [#allocation4], 4294967040 }
 0x2b5   :  { %2912 = dma.done.wait [#allocation12], 256  }
 0x2b6   :  { %2913 = vsyncadd [#allocation12], 4294967040 }
 0x2b7   :  { %2096 = vsyncpa [#allocation3], 1 }
 0x2b8   :  { %2097 = vsyncpa [#allocation6], 1 }
 0x2b9   :  { %2098 = vsyncpa [#allocation9], 1 }
 0x2ba   :  { %2099 = vsyncpa [#allocation4], 1 }
 0x2bb   :  { %2100 = vsyncpa [#allocation12], 1 }

</bundles_post_ra>
